<compile_context>
chip_gen: v7x
topology: tpu7x:2x2x1
jax: 0.10.0
libtpu: 0.0.40
codegen_flags: <defaults>
</compile_context>

<pallas_src>
import math
import functools

import jax
import jax.numpy as jnp
from jax.experimental import pallas as pl
from jax.experimental.pallas import tpu as pltpu

LANE = 128  # vreg lane width; every fused-weight block is padded to this


# ----------------------------- fused forward kernel ---------------------------

def fused_forward_kernel(x_ref, rope_ref, mhpack_ref,
                         w_attn_ref, wo_ref, w_ug_ref, w_down_ref,
                         vecs_ref, w_out_ref, out_ref, *,
                         num_layers, num_heads, head_dim, batch, seq, hidden):
    D = num_heads * head_dim
    BS = batch * seq
    attn_scale = float(head_dim) ** 0.5      # n-GPT convention: multiply by sqrt(hd)

    h = x_ref[...]                           # (BS, D) f32 resident activation

    # RoPE tables arrive as (2, S, D); broadcast over batch once, hoisted out of layers.
    sin_sd = rope_ref[0]
    cos_sd = rope_ref[1]
    sin = jnp.concatenate([sin_sd] * batch, axis=0)      # (BS, D)
    cos = jnp.concatenate([cos_sd] * batch, axis=0)

    # Padded head-indicator matrices (D, D); padding rows/cols are zero so the padded
    # rsqrt garbage never contributes and no narrow slices are needed.
    mh = mhpack_ref[0]
    mht = mhpack_ref[1]

    # Causal additive bias built in-kernel; diagonal always kept -> exp rows never all-zero.
    row = jax.lax.broadcasted_iota(jnp.int32, (seq, seq), 0)
    col = jax.lax.broadcasted_iota(jnp.int32, (seq, seq), 1)
    mask_bias = jnp.where(row >= col, 0.0, -1e30).astype(jnp.float32)     # (S, S)

    def cosine_norm_rows(x):                 # cosine norm over the full feature dim
        ss = jnp.sum(x * x, axis=-1, keepdims=True)
        return x * jax.lax.rsqrt(jnp.maximum(ss, 1e-12))   # clamp(norm,1e-6) == max(ss,1e-12)

    def head_norm_scale(x, s_eff):           # per-head cosine norm then * s_qk, all 32-lane wide
        ss = jnp.dot(x * x, mh, preferred_element_type=jnp.float32)       # (BS, D)
        inv = jax.lax.rsqrt(jnp.maximum(ss, 1e-12))
        inv_full = jnp.dot(inv, mht, preferred_element_type=jnp.float32)  # (BS, D)
        return x * inv_full * s_eff

    for li in range(num_layers):             # static unroll over layers
        vl = vecs_ref[li]                    # (8, 128) packed per-layer vectors
        sqk = vl[0:1, 0:D]
        aA = vl[1:2, 0:D]
        aM = vl[2:3, 0:D]
        su = vl[3:4, 0:hidden]
        sv = vl[4:5, 0:hidden]

        # ---------------- attention ----------------
        h_bf = h.astype(jnp.bfloat16)
        # fused [Wq | Wq@R | Wk | Wk@R | Wv], each block padded to 128 lanes -> aligned slices
        proj = jnp.dot(h_bf, w_attn_ref[li], preferred_element_type=jnp.float32)  # (BS, 640)
        q = proj[:, 0 * LANE:0 * LANE + D]
        qr = proj[:, 1 * LANE:1 * LANE + D]
        k = proj[:, 2 * LANE:2 * LANE + D]
        kr = proj[:, 3 * LANE:3 * LANE + D]
        v = proj[:, 4 * LANE:4 * LANE + D]

        # RoPE (rotation folded into the weights): x*cos + rot(x)*sin
        q = q * cos + qr * sin
        k = k * cos + kr * sin

        q = head_norm_scale(q, sqk)
        k = head_norm_scale(k, sqk)

        q3 = q.reshape(batch, seq, D).astype(jnp.bfloat16)
        k3 = k.reshape(batch, seq, D).astype(jnp.bfloat16)
        v3 = v.reshape(batch, seq, D).astype(jnp.bfloat16)

        ctx_parts = []
        for hi in range(num_heads):          # short static loop; only scores/context here
            lo = hi * head_dim
            qh = q3[:, :, lo:lo + head_dim]
            kh = k3[:, :, lo:lo + head_dim]
            vh = v3[:, :, lo:lo + head_dim]
            logits = jnp.einsum('bqd,bkd->bqk', qh, kh,
                                preferred_element_type=jnp.float32)        # (B, S, S)
            logits = logits * attn_scale + mask_bias[None, :, :]
            # q,k cosine-normalized + s_qk O(1) -> logits bounded; no max-subtraction needed,
            # masked entries exp(-1e30) underflow to exactly 0.
            p = jnp.exp(logits)
            denom = jnp.sum(p, axis=-1, keepdims=True)
            p = p * pl.reciprocal(denom, approx=True)
            ctx = jnp.einsum('bqk,bkd->bqd', p.astype(jnp.bfloat16), vh,
                             preferred_element_type=jnp.float32)           # (B, S, hd)
            ctx_parts.append(ctx)

        # one (BS,D)@(D,D) Wo matmul instead of four K=8 partials + add chain
        ctx_full = jnp.concatenate(ctx_parts, axis=-1).reshape(BS, D)
        attn_out = jnp.dot(ctx_full.astype(jnp.bfloat16), wo_ref[li],
                           preferred_element_type=jnp.float32)             # (BS, D)

        h_A = cosine_norm_rows(attn_out)
        h = cosine_norm_rows(h + aA * (h_A - h))

        # ---------------- gated MLP ----------------
        ug = jnp.dot(h.astype(jnp.bfloat16), w_ug_ref[li],
                     preferred_element_type=jnp.float32)                   # (BS, 256)
        u = ug[:, 0:hidden] * su                       # effective s_u
        g = ug[:, LANE:LANE + hidden] * sv             # effective s_v * sqrt(D) folded in
        sig = pl.reciprocal(1.0 + jnp.exp(-g), approx=True)   # sigmoid via EUP reciprocal
        act = u * (g * sig)                            # u * silu(g), f32
        m_out = jnp.dot(act.astype(jnp.bfloat16), w_down_ref[li],
                        preferred_element_type=jnp.float32)                # (BS, D)

        h_M = cosine_norm_rows(m_out)
        h = cosine_norm_rows(h + aM * (h_M - h))

    # -------- vocab projection: lane-dense padded (BS, 128) output slab ----------
    out_ref[...] = jnp.dot(h.astype(jnp.bfloat16), w_out_ref[...],
                           preferred_element_type=jnp.float32)


# ----------------------------- host-side helpers ------------------------------

def _rope_tables(seq, num_heads, head_dim, theta):
    # Matches PrecomputeRotaryFrequencies; tiled over heads only -> (2, S, D).
    inv_freq = 1.0 / (theta ** (jnp.arange(0, head_dim, 2, dtype=jnp.float32) / head_dim))
    t = jnp.arange(seq, dtype=jnp.float32)
    freqs = jnp.einsum('i,j->ij', t, inv_freq)            # (S, hd/2)
    emb = jnp.concatenate([freqs, freqs], axis=-1)        # (S, hd)
    sin = jnp.tile(jnp.sin(emb), (1, num_heads))          # (S, D)
    cos = jnp.tile(jnp.cos(emb), (1, num_heads))
    return jnp.stack([sin, cos], axis=0)                  # (2, S, D)


def _rope_rotation_matrix(num_heads, head_dim):
    # Per-head block R such that (x @ R) == cat(-x2, x1) per head.
    half = head_dim // 2
    eye = jnp.eye(half, dtype=jnp.float32)
    zero = jnp.zeros((half, half), jnp.float32)
    r_head = jnp.concatenate(
        [jnp.concatenate([zero, eye], axis=1),
         jnp.concatenate([-eye, zero], axis=1)], axis=0)   # (hd, hd)
    return jnp.kron(jnp.eye(num_heads, dtype=jnp.float32), r_head)   # (D, D)


def _head_indicator_padded(num_heads, head_dim):
    # (2, D, D): [0] = head indicator padded to D columns, [1] = its transpose.
    D = num_heads * head_dim
    mh = jnp.kron(jnp.eye(num_heads, dtype=jnp.float32),
                  jnp.ones((head_dim, 1), jnp.float32))    # (D, H)
    mh_p = jnp.zeros((D, D), jnp.float32).at[:, :num_heads].set(mh)
    return jnp.stack([mh_p, mh_p.T], axis=0)


# ----------------------------- config / params --------------------------------

class Cfg:
    dim = 32
    num_heads = 4
    num_layers = 2
    max_seq_len = 8
    vocab_len = 64
    theta = 10000.0
    mlp_hidden_mult = 3   # hidden = int(dim * mult * 2/3) = 64


def init_params(key, cfg):
    D = cfg.dim
    H = cfg.num_heads
    hd = D // H
    hidden = int(cfg.dim * cfg.mlp_hidden_mult * 2 / 3)
    std = 1.0 / math.sqrt(D)
    keys = jax.random.split(key, 2 + cfg.num_layers)

    def nrm(k, shape, s=std):
        return jax.random.normal(k, shape, dtype=jnp.float32) * s

    s_qk_scale = 1.0 / math.sqrt(D)
    params = {
        'emb': nrm(keys[0], (cfg.vocab_len, D), 1.0),
        'w_out': nrm(keys[1], (D, cfg.vocab_len)),   # stored (in, out): y = x @ W
        'layers': [],
    }
    for li in range(cfg.num_layers):
        lk = jax.random.split(keys[2 + li], 7)
        params['layers'].append({
            'wq': nrm(lk[0], (D, D)), 'wk': nrm(lk[1], (D, D)),
            'wv': nrm(lk[2], (D, D)), 'wo': nrm(lk[3], (D, D)),
            's_qk': jnp.full((H, hd), s_qk_scale, jnp.float32),   # torch init = ones*scale
            'a_A': jnp.full((D,), 1.0 / math.sqrt(D), jnp.float32),
            'wup': nrm(lk[4], (D, hidden)), 'wgate': nrm(lk[5], (D, hidden)),
            'wdown': nrm(lk[6], (hidden, D)),
            's_u': jnp.ones((hidden,), jnp.float32),
            's_v': jnp.ones((hidden,), jnp.float32),
            'a_M': jnp.full((D,), 1.0 / math.sqrt(D), jnp.float32),
        })
    return params


def pack_params(params, cfg):
    """Fuse / pad / pre-transform weights (normally cached once per model)."""
    D = cfg.dim
    H = cfg.num_heads
    hd = D // H
    hidden = int(cfg.dim * cfg.mlp_hidden_mult * 2 / 3)
    assert cfg.vocab_len <= LANE and hidden <= LANE and D <= LANE
    R = _rope_rotation_matrix(H, hd)
    s_qk_scale = 1.0 / math.sqrt(D)

    w_attn, wo, w_ug, wdn, vecs = [], [], [], [], []
    for lp in params['layers']:
        wa = jnp.zeros((D, 5 * LANE), jnp.float32)
        for i, blk in enumerate([lp['wq'], lp['wq'] @ R, lp['wk'], lp['wk'] @ R, lp['wv']]):
            wa = wa.at[:, i * LANE:i * LANE + D].set(blk)
        w_attn.append(wa)
        wo.append(lp['wo'])

        wug = jnp.zeros((D, 2 * LANE), jnp.float32)
        wug = wug.at[:, 0:hidden].set(lp['wup'])
        wug = wug.at[:, LANE:LANE + hidden].set(lp['wgate'])
        w_ug.append(wug)
        wdn.append(lp['wdown'])

        vl = jnp.zeros((8, LANE), jnp.float32)
        vl = vl.at[0, :D].set((lp['s_qk'] * (1.0 / s_qk_scale)).reshape(D))  # effective s_qk
        vl = vl.at[1, :D].set(lp['a_A'])
        vl = vl.at[2, :D].set(lp['a_M'])
        vl = vl.at[3, :hidden].set(lp['s_u'])                    # effective s_u
        vl = vl.at[4, :hidden].set(lp['s_v'] * math.sqrt(D))     # effective s_v * sqrt(D)
        vecs.append(vl)

    w_out_p = jnp.zeros((D, LANE), jnp.float32).at[:, :cfg.vocab_len].set(params['w_out'])

    return {
        'w_attn': jnp.stack(w_attn).astype(jnp.bfloat16),   # (L, D, 640)
        'wo': jnp.stack(wo).astype(jnp.bfloat16),            # (L, D, D)
        'w_ug': jnp.stack(w_ug).astype(jnp.bfloat16),        # (L, D, 256)
        'w_down': jnp.stack(wdn).astype(jnp.bfloat16),       # (L, hidden, D)
        'vecs': jnp.stack(vecs),                              # (L, 8, 128) f32
        'w_out': w_out_p.astype(jnp.bfloat16),                # (D, 128)
    }


def model_forward(params, cfg, input_token_ids):
    B, S = input_token_ids.shape
    D = cfg.dim
    H = cfg.num_heads
    hd = D // H
    hidden = int(cfg.dim * cfg.mlp_hidden_mult * 2 / 3)
    BS = B * S
    L = cfg.num_layers

    rope = _rope_tables(S, H, hd, cfg.theta)
    mhpack = _head_indicator_padded(H, hd)
    packed = pack_params(params, cfg)

    # token embedding (glue, plain JAX), flattened to (B*S, D)
    x = jnp.take(params['emb'], input_token_ids.reshape(BS), axis=0)

    kernel = functools.partial(
        fused_forward_kernel,
        num_layers=L, num_heads=H, head_dim=hd,
        batch=B, seq=S, hidden=hidden)

    args = (x, rope, mhpack,
            packed['w_attn'], packed['wo'], packed['w_ug'], packed['w_down'],
            packed['vecs'], packed['w_out'])

    # Advisory cost hint so XLA can overlap the surrounding HLO with the custom call.
    mm_flops = L * (2 * BS * D * 5 * LANE          # fused qkv+rope projection (padded)
                    + 4 * H * B * S * S * hd        # scores + context
                    + 2 * BS * D * D                # Wo
                    + 4 * 2 * BS * D * D            # per-head norms (q,k) x 2 indicator matmuls
                    + 2 * BS * D * 2 * LANE         # up/gate (padded)
                    + 2 * BS * hidden * D)          # down
    mm_flops += 2 * BS * D * LANE                   # vocab projection
    transcendentals = L * (H * B * S * S + 3 * BS * hidden + 8 * BS)
    bytes_accessed = sum(int(a.size) * a.dtype.itemsize for a in args) + BS * LANE * 4

    out = pl.pallas_call(
        kernel,
        out_shape=jax.ShapeDtypeStruct((BS, LANE), jnp.float32),
        in_specs=[pl.BlockSpec(memory_space=pltpu.MemorySpace.VMEM)] * len(args),
        out_specs=pl.BlockSpec(memory_space=pltpu.MemorySpace.VMEM),
        cost_estimate=pl.CostEstimate(flops=int(mm_flops),
                                      transcendentals=int(transcendentals),
                                      bytes_accessed=int(bytes_accessed)),
    )(*args)

    # Model.forward returns unscaled logits (s_z only scales logits fed into the CE loss).
    # TODO(synk): cross-entropy loss branch of Model.forward not implemented (no targets here).
    return out[:, :cfg.vocab_len].reshape(B, S, cfg.vocab_len)


# ----------------------------- main --------------------------------------------

if __name__ == "__main__":
    cfg = Cfg()
    key = jax.random.PRNGKey(0)
    pkey, dkey = jax.random.split(key)
    params = init_params(pkey, cfg)

    B, S = 2, cfg.max_seq_len
    input_ids = jax.random.randint(dkey, (B, S), 0, cfg.vocab_len, dtype=jnp.int32)

    logits = model_forward(params, cfg, input_ids)
    logits = jax.block_until_ready(logits)

    assert logits.shape == (B, S, cfg.vocab_len), logits.shape
    assert bool(jnp.all(jnp.isfinite(logits)))
    print("KERNEL_OK")
</pallas_src>

<mosaic_0001>
module attributes {stable_mosaic.version = 11 : i64} {
  func.func @fused_forward_kernel(%arg0: memref<16x32xf32, #tpu.memory_space<vmem>>, %arg1: memref<2x8x32xf32, #tpu.memory_space<vmem>>, %arg2: memref<2x32x32xf32, #tpu.memory_space<vmem>>, %arg3: memref<2x32x640xbf16, #tpu.memory_space<vmem>>, %arg4: memref<2x32x32xbf16, #tpu.memory_space<vmem>>, %arg5: memref<2x32x256xbf16, #tpu.memory_space<vmem>>, %arg6: memref<2x64x32xbf16, #tpu.memory_space<vmem>>, %arg7: memref<2x8x128xf32, #tpu.memory_space<vmem>>, %arg8: memref<32x128xbf16, #tpu.memory_space<vmem>>, %arg9: memref<16x128xf32, #tpu.memory_space<vmem>>) attributes {dimension_semantics = [], scalar_prefetch = 0 : i64, scratch_operands = 0 : i64, tpu.core_type = #tpu.core_type<tc>} {
    %c0 = arith.constant 0 : index
    %c0_0 = arith.constant 0 : index
    %0 = vector.load %arg0[%c0, %c0_0] : memref<16x32xf32, #tpu.memory_space<vmem>>, vector<16x32xf32>
    %c0_1 = arith.constant 0 : index
    %c0_2 = arith.constant 0 : index
    %c0_3 = arith.constant 0 : index
    %1 = vector.load %arg1[%c0_1, %c0_2, %c0_3] : memref<2x8x32xf32, #tpu.memory_space<vmem>>, vector<1x8x32xf32>
    %2 = vector.shape_cast %1 : vector<1x8x32xf32> to vector<8x32xf32>
    %c1 = arith.constant 1 : index
    %c0_4 = arith.constant 0 : index
    %c0_5 = arith.constant 0 : index
    %3 = vector.load %arg1[%c1, %c0_4, %c0_5] : memref<2x8x32xf32, #tpu.memory_space<vmem>>, vector<1x8x32xf32>
    %4 = vector.shape_cast %3 : vector<1x8x32xf32> to vector<8x32xf32>
    %5 = tpu.concatenate %2, %2 in 0 : vector<8x32xf32>, vector<8x32xf32> -> vector<16x32xf32>
    %6 = tpu.concatenate %4, %4 in 0 : vector<8x32xf32>, vector<8x32xf32> -> vector<16x32xf32>
    %c0_6 = arith.constant 0 : index
    %c0_7 = arith.constant 0 : index
    %c0_8 = arith.constant 0 : index
    %7 = vector.load %arg2[%c0_6, %c0_7, %c0_8] : memref<2x32x32xf32, #tpu.memory_space<vmem>>, vector<1x32x32xf32>
    %8 = vector.shape_cast %7 : vector<1x32x32xf32> to vector<32x32xf32>
    %c1_9 = arith.constant 1 : index
    %c0_10 = arith.constant 0 : index
    %c0_11 = arith.constant 0 : index
    %9 = vector.load %arg2[%c1_9, %c0_10, %c0_11] : memref<2x32x32xf32, #tpu.memory_space<vmem>>, vector<1x32x32xf32>
    %10 = vector.shape_cast %9 : vector<1x32x32xf32> to vector<32x32xf32>
    %11 = tpu.iota {dimensions = array<i32: 0>} : vector<8x8xi32>
    %12 = tpu.iota {dimensions = array<i32: 1>} : vector<8x8xi32>
    %13 = arith.cmpi sge, %11, %12 : vector<8x8xi32>
    %cst = arith.constant 0.000000e+00 : f32
    %cst_12 = arith.constant -1.000000e+30 : f32
    %14 = vector.broadcast %cst : f32 to vector<8x8xf32>
    %15 = vector.broadcast %cst_12 : f32 to vector<8x8xf32>
    %16 = arith.select %13, %14, %15 : vector<8x8xi1>, vector<8x8xf32>
    %c0_13 = arith.constant 0 : index
    %c0_14 = arith.constant 0 : index
    %c0_15 = arith.constant 0 : index
    %17 = vector.load %arg7[%c0_13, %c0_14, %c0_15] : memref<2x8x128xf32, #tpu.memory_space<vmem>>, vector<1x8x128xf32>
    %18 = vector.shape_cast %17 : vector<1x8x128xf32> to vector<8x128xf32>
    %19 = vector.extract_strided_slice %18 {offsets = [0, 0], sizes = [1, 32], strides = [1, 1]} : vector<8x128xf32> to vector<1x32xf32>
    %20 = vector.extract_strided_slice %18 {offsets = [1, 0], sizes = [1, 32], strides = [1, 1]} : vector<8x128xf32> to vector<1x32xf32>
    %21 = vector.extract_strided_slice %18 {offsets = [2, 0], sizes = [1, 32], strides = [1, 1]} : vector<8x128xf32> to vector<1x32xf32>
    %22 = vector.extract_strided_slice %18 {offsets = [3, 0], sizes = [1, 64], strides = [1, 1]} : vector<8x128xf32> to vector<1x64xf32>
    %23 = vector.extract_strided_slice %18 {offsets = [4, 0], sizes = [1, 64], strides = [1, 1]} : vector<8x128xf32> to vector<1x64xf32>
    %24 = arith.truncf %0 : vector<16x32xf32> to vector<16x32xbf16>
    %c0_16 = arith.constant 0 : index
    %c0_17 = arith.constant 0 : index
    %c0_18 = arith.constant 0 : index
    %25 = vector.load %arg3[%c0_16, %c0_17, %c0_18] : memref<2x32x640xbf16, #tpu.memory_space<vmem>>, vector<1x32x640xbf16>
    %26 = vector.shape_cast %25 : vector<1x32x640xbf16> to vector<32x640xbf16>
    %cst_19 = arith.constant dense<0.000000e+00> : vector<16x640xf32>
    %27 = tpu.matmul %24, %26, %cst_19 {dimension_numbers = #tpu.dot_dimension_numbers<[1], [0], [0], [1], [0, 0, 1, 1], [], []>} : vector<16x32xbf16>, vector<32x640xbf16>, vector<16x640xf32> -> vector<16x640xf32>
    %28 = vector.extract_strided_slice %27 {offsets = [0, 0], sizes = [16, 32], strides = [1, 1]} : vector<16x640xf32> to vector<16x32xf32>
    %29 = vector.extract_strided_slice %27 {offsets = [0, 128], sizes = [16, 32], strides = [1, 1]} : vector<16x640xf32> to vector<16x32xf32>
    %30 = vector.extract_strided_slice %27 {offsets = [0, 256], sizes = [16, 32], strides = [1, 1]} : vector<16x640xf32> to vector<16x32xf32>
    %31 = vector.extract_strided_slice %27 {offsets = [0, 384], sizes = [16, 32], strides = [1, 1]} : vector<16x640xf32> to vector<16x32xf32>
    %32 = vector.extract_strided_slice %27 {offsets = [0, 512], sizes = [16, 32], strides = [1, 1]} : vector<16x640xf32> to vector<16x32xf32>
    %33 = arith.mulf %28, %6 : vector<16x32xf32>
    %34 = arith.mulf %29, %5 : vector<16x32xf32>
    %35 = arith.addf %33, %34 : vector<16x32xf32>
    %36 = arith.mulf %30, %6 : vector<16x32xf32>
    %37 = arith.mulf %31, %5 : vector<16x32xf32>
    %38 = arith.addf %36, %37 : vector<16x32xf32>
    %39 = arith.mulf %35, %35 : vector<16x32xf32>
    %cst_20 = arith.constant dense<0.000000e+00> : vector<16x32xf32>
    %40 = tpu.matmul %39, %8, %cst_20 {dimension_numbers = #tpu.dot_dimension_numbers<[1], [0], [0], [1], [0, 0, 1, 1], [], []>} : vector<16x32xf32>, vector<32x32xf32>, vector<16x32xf32> -> vector<16x32xf32>
    %cst_21 = arith.constant 9.99999996E-13 : f32
    %41 = vector.broadcast %cst_21 : f32 to vector<16x32xf32>
    %42 = arith.maximumf %40, %41 : vector<16x32xf32>
    %43 = math.rsqrt %42 : vector<16x32xf32>
    %cst_22 = arith.constant dense<0.000000e+00> : vector<16x32xf32>
    %44 = tpu.matmul %43, %10, %cst_22 {dimension_numbers = #tpu.dot_dimension_numbers<[1], [0], [0], [1], [0, 0, 1, 1], [], []>} : vector<16x32xf32>, vector<32x32xf32>, vector<16x32xf32> -> vector<16x32xf32>
    %45 = arith.mulf %35, %44 : vector<16x32xf32>
    %46 = vector.broadcast %19 : vector<1x32xf32> to vector<16x32xf32>
    %47 = arith.mulf %45, %46 : vector<16x32xf32>
    %48 = arith.mulf %38, %38 : vector<16x32xf32>
    %cst_23 = arith.constant dense<0.000000e+00> : vector<16x32xf32>
    %49 = tpu.matmul %48, %8, %cst_23 {dimension_numbers = #tpu.dot_dimension_numbers<[1], [0], [0], [1], [0, 0, 1, 1], [], []>} : vector<16x32xf32>, vector<32x32xf32>, vector<16x32xf32> -> vector<16x32xf32>
    %cst_24 = arith.constant 9.99999996E-13 : f32
    %50 = vector.broadcast %cst_24 : f32 to vector<16x32xf32>
    %51 = arith.maximumf %49, %50 : vector<16x32xf32>
    %52 = math.rsqrt %51 : vector<16x32xf32>
    %cst_25 = arith.constant dense<0.000000e+00> : vector<16x32xf32>
    %53 = tpu.matmul %52, %10, %cst_25 {dimension_numbers = #tpu.dot_dimension_numbers<[1], [0], [0], [1], [0, 0, 1, 1], [], []>} : vector<16x32xf32>, vector<32x32xf32>, vector<16x32xf32> -> vector<16x32xf32>
    %54 = arith.mulf %38, %53 : vector<16x32xf32>
    %55 = vector.broadcast %19 : vector<1x32xf32> to vector<16x32xf32>
    %56 = arith.mulf %54, %55 : vector<16x32xf32>
    %57 = vector.shape_cast %47 : vector<16x32xf32> to vector<2x8x32xf32>
    %58 = arith.truncf %57 : vector<2x8x32xf32> to vector<2x8x32xbf16>
    %59 = vector.shape_cast %56 : vector<16x32xf32> to vector<2x8x32xf32>
    %60 = arith.truncf %59 : vector<2x8x32xf32> to vector<2x8x32xbf16>
    %61 = vector.shape_cast %32 : vector<16x32xf32> to vector<2x8x32xf32>
    %62 = arith.truncf %61 : vector<2x8x32xf32> to vector<2x8x32xbf16>
    %63 = vector.extract_strided_slice %58 {offsets = [0, 0, 0], sizes = [2, 8, 8], strides = [1, 1, 1]} : vector<2x8x32xbf16> to vector<2x8x8xbf16>
    %64 = vector.extract_strided_slice %60 {offsets = [0, 0, 0], sizes = [2, 8, 8], strides = [1, 1, 1]} : vector<2x8x32xbf16> to vector<2x8x8xbf16>
    %65 = vector.extract_strided_slice %62 {offsets = [0, 0, 0], sizes = [2, 8, 8], strides = [1, 1, 1]} : vector<2x8x32xbf16> to vector<2x8x8xbf16>
    "tpu.trace_start"() <{level = 10 : i32, message = "bqd,bkd->bqk"}> : () -> ()
    %cst_26 = arith.constant dense<0.000000e+00> : vector<2x8x8xf32>
    %66 = tpu.matmul %63, %64, %cst_26 {dimension_numbers = #tpu.dot_dimension_numbers<[2], [2], [1], [1], [0, 0, 0, 1, 1, 1], [0], [0]>} : vector<2x8x8xbf16>, vector<2x8x8xbf16>, vector<2x8x8xf32> -> vector<2x8x8xf32>
    "tpu.trace_stop"() : () -> ()
    %cst_27 = arith.constant 2.82842708 : f32
    %67 = vector.broadcast %cst_27 : f32 to vector<2x8x8xf32>
    %68 = arith.mulf %66, %67 : vector<2x8x8xf32>
    %69 = vector.shape_cast %16 : vector<8x8xf32> to vector<1x8x8xf32>
    %70 = vector.broadcast %69 : vector<1x8x8xf32> to vector<2x8x8xf32>
    %71 = arith.addf %68, %70 : vector<2x8x8xf32>
    %72 = math.exp %71 : vector<2x8x8xf32>
    %cst_28 = arith.constant dense<0.000000e+00> : vector<2x8xf32>
    %73 = vector.multi_reduction <add>, %72, %cst_28 [2] : vector<2x8x8xf32> to vector<2x8xf32>
    %74 = vector.shape_cast %73 : vector<2x8xf32> to vector<2x8x1xf32>
    %75 = tpu.reciprocal %74 {approx = true} : vector<2x8x1xf32> -> vector<2x8x1xf32>
    %76 = vector.broadcast %75 : vector<2x8x1xf32> to vector<2x8x8xf32>
    %77 = arith.mulf %72, %76 : vector<2x8x8xf32>
    %78 = arith.truncf %77 : vector<2x8x8xf32> to vector<2x8x8xbf16>
    "tpu.trace_start"() <{level = 10 : i32, message = "bqk,bkd->bqd"}> : () -> ()
    %cst_29 = arith.constant dense<0.000000e+00> : vector<2x8x8xf32>
    %79 = tpu.matmul %78, %65, %cst_29 {dimension_numbers = #tpu.dot_dimension_numbers<[2], [1], [1], [2], [0, 0, 0, 1, 1, 2], [0], [0]>} : vector<2x8x8xbf16>, vector<2x8x8xbf16>, vector<2x8x8xf32> -> vector<2x8x8xf32>
    "tpu.trace_stop"() : () -> ()
    %80 = vector.extract_strided_slice %58 {offsets = [0, 0, 8], sizes = [2, 8, 8], strides = [1, 1, 1]} : vector<2x8x32xbf16> to vector<2x8x8xbf16>
    %81 = vector.extract_strided_slice %60 {offsets = [0, 0, 8], sizes = [2, 8, 8], strides = [1, 1, 1]} : vector<2x8x32xbf16> to vector<2x8x8xbf16>
    %82 = vector.extract_strided_slice %62 {offsets = [0, 0, 8], sizes = [2, 8, 8], strides = [1, 1, 1]} : vector<2x8x32xbf16> to vector<2x8x8xbf16>
    "tpu.trace_start"() <{level = 10 : i32, message = "bqd,bkd->bqk"}> : () -> ()
    %cst_30 = arith.constant dense<0.000000e+00> : vector<2x8x8xf32>
    %83 = tpu.matmul %80, %81, %cst_30 {dimension_numbers = #tpu.dot_dimension_numbers<[2], [2], [1], [1], [0, 0, 0, 1, 1, 1], [0], [0]>} : vector<2x8x8xbf16>, vector<2x8x8xbf16>, vector<2x8x8xf32> -> vector<2x8x8xf32>
    "tpu.trace_stop"() : () -> ()
    %cst_31 = arith.constant 2.82842708 : f32
    %84 = vector.broadcast %cst_31 : f32 to vector<2x8x8xf32>
    %85 = arith.mulf %83, %84 : vector<2x8x8xf32>
    %86 = vector.shape_cast %16 : vector<8x8xf32> to vector<1x8x8xf32>
    %87 = vector.broadcast %86 : vector<1x8x8xf32> to vector<2x8x8xf32>
    %88 = arith.addf %85, %87 : vector<2x8x8xf32>
    %89 = math.exp %88 : vector<2x8x8xf32>
    %cst_32 = arith.constant dense<0.000000e+00> : vector<2x8xf32>
    %90 = vector.multi_reduction <add>, %89, %cst_32 [2] : vector<2x8x8xf32> to vector<2x8xf32>
    %91 = vector.shape_cast %90 : vector<2x8xf32> to vector<2x8x1xf32>
    %92 = tpu.reciprocal %91 {approx = true} : vector<2x8x1xf32> -> vector<2x8x1xf32>
    %93 = vector.broadcast %92 : vector<2x8x1xf32> to vector<2x8x8xf32>
    %94 = arith.mulf %89, %93 : vector<2x8x8xf32>
    %95 = arith.truncf %94 : vector<2x8x8xf32> to vector<2x8x8xbf16>
    "tpu.trace_start"() <{level = 10 : i32, message = "bqk,bkd->bqd"}> : () -> ()
    %cst_33 = arith.constant dense<0.000000e+00> : vector<2x8x8xf32>
    %96 = tpu.matmul %95, %82, %cst_33 {dimension_numbers = #tpu.dot_dimension_numbers<[2], [1], [1], [2], [0, 0, 0, 1, 1, 2], [0], [0]>} : vector<2x8x8xbf16>, vector<2x8x8xbf16>, vector<2x8x8xf32> -> vector<2x8x8xf32>
    "tpu.trace_stop"() : () -> ()
    %97 = vector.extract_strided_slice %58 {offsets = [0, 0, 16], sizes = [2, 8, 8], strides = [1, 1, 1]} : vector<2x8x32xbf16> to vector<2x8x8xbf16>
    %98 = vector.extract_strided_slice %60 {offsets = [0, 0, 16], sizes = [2, 8, 8], strides = [1, 1, 1]} : vector<2x8x32xbf16> to vector<2x8x8xbf16>
    %99 = vector.extract_strided_slice %62 {offsets = [0, 0, 16], sizes = [2, 8, 8], strides = [1, 1, 1]} : vector<2x8x32xbf16> to vector<2x8x8xbf16>
    "tpu.trace_start"() <{level = 10 : i32, message = "bqd,bkd->bqk"}> : () -> ()
    %cst_34 = arith.constant dense<0.000000e+00> : vector<2x8x8xf32>
    %100 = tpu.matmul %97, %98, %cst_34 {dimension_numbers = #tpu.dot_dimension_numbers<[2], [2], [1], [1], [0, 0, 0, 1, 1, 1], [0], [0]>} : vector<2x8x8xbf16>, vector<2x8x8xbf16>, vector<2x8x8xf32> -> vector<2x8x8xf32>
    "tpu.trace_stop"() : () -> ()
    %cst_35 = arith.constant 2.82842708 : f32
    %101 = vector.broadcast %cst_35 : f32 to vector<2x8x8xf32>
    %102 = arith.mulf %100, %101 : vector<2x8x8xf32>
    %103 = vector.shape_cast %16 : vector<8x8xf32> to vector<1x8x8xf32>
    %104 = vector.broadcast %103 : vector<1x8x8xf32> to vector<2x8x8xf32>
    %105 = arith.addf %102, %104 : vector<2x8x8xf32>
    %106 = math.exp %105 : vector<2x8x8xf32>
    %cst_36 = arith.constant dense<0.000000e+00> : vector<2x8xf32>
    %107 = vector.multi_reduction <add>, %106, %cst_36 [2] : vector<2x8x8xf32> to vector<2x8xf32>
    %108 = vector.shape_cast %107 : vector<2x8xf32> to vector<2x8x1xf32>
    %109 = tpu.reciprocal %108 {approx = true} : vector<2x8x1xf32> -> vector<2x8x1xf32>
    %110 = vector.broadcast %109 : vector<2x8x1xf32> to vector<2x8x8xf32>
    %111 = arith.mulf %106, %110 : vector<2x8x8xf32>
    %112 = arith.truncf %111 : vector<2x8x8xf32> to vector<2x8x8xbf16>
    "tpu.trace_start"() <{level = 10 : i32, message = "bqk,bkd->bqd"}> : () -> ()
    %cst_37 = arith.constant dense<0.000000e+00> : vector<2x8x8xf32>
    %113 = tpu.matmul %112, %99, %cst_37 {dimension_numbers = #tpu.dot_dimension_numbers<[2], [1], [1], [2], [0, 0, 0, 1, 1, 2], [0], [0]>} : vector<2x8x8xbf16>, vector<2x8x8xbf16>, vector<2x8x8xf32> -> vector<2x8x8xf32>
    "tpu.trace_stop"() : () -> ()
    %114 = vector.extract_strided_slice %58 {offsets = [0, 0, 24], sizes = [2, 8, 8], strides = [1, 1, 1]} : vector<2x8x32xbf16> to vector<2x8x8xbf16>
    %115 = vector.extract_strided_slice %60 {offsets = [0, 0, 24], sizes = [2, 8, 8], strides = [1, 1, 1]} : vector<2x8x32xbf16> to vector<2x8x8xbf16>
    %116 = vector.extract_strided_slice %62 {offsets = [0, 0, 24], sizes = [2, 8, 8], strides = [1, 1, 1]} : vector<2x8x32xbf16> to vector<2x8x8xbf16>
    "tpu.trace_start"() <{level = 10 : i32, message = "bqd,bkd->bqk"}> : () -> ()
    %cst_38 = arith.constant dense<0.000000e+00> : vector<2x8x8xf32>
    %117 = tpu.matmul %114, %115, %cst_38 {dimension_numbers = #tpu.dot_dimension_numbers<[2], [2], [1], [1], [0, 0, 0, 1, 1, 1], [0], [0]>} : vector<2x8x8xbf16>, vector<2x8x8xbf16>, vector<2x8x8xf32> -> vector<2x8x8xf32>
    "tpu.trace_stop"() : () -> ()
    %cst_39 = arith.constant 2.82842708 : f32
    %118 = vector.broadcast %cst_39 : f32 to vector<2x8x8xf32>
    %119 = arith.mulf %117, %118 : vector<2x8x8xf32>
    %120 = vector.shape_cast %16 : vector<8x8xf32> to vector<1x8x8xf32>
    %121 = vector.broadcast %120 : vector<1x8x8xf32> to vector<2x8x8xf32>
    %122 = arith.addf %119, %121 : vector<2x8x8xf32>
    %123 = math.exp %122 : vector<2x8x8xf32>
    %cst_40 = arith.constant dense<0.000000e+00> : vector<2x8xf32>
    %124 = vector.multi_reduction <add>, %123, %cst_40 [2] : vector<2x8x8xf32> to vector<2x8xf32>
    %125 = vector.shape_cast %124 : vector<2x8xf32> to vector<2x8x1xf32>
    %126 = tpu.reciprocal %125 {approx = true} : vector<2x8x1xf32> -> vector<2x8x1xf32>
    %127 = vector.broadcast %126 : vector<2x8x1xf32> to vector<2x8x8xf32>
    %128 = arith.mulf %123, %127 : vector<2x8x8xf32>
    %129 = arith.truncf %128 : vector<2x8x8xf32> to vector<2x8x8xbf16>
    "tpu.trace_start"() <{level = 10 : i32, message = "bqk,bkd->bqd"}> : () -> ()
    %cst_41 = arith.constant dense<0.000000e+00> : vector<2x8x8xf32>
    %130 = tpu.matmul %129, %116, %cst_41 {dimension_numbers = #tpu.dot_dimension_numbers<[2], [1], [1], [2], [0, 0, 0, 1, 1, 2], [0], [0]>} : vector<2x8x8xbf16>, vector<2x8x8xbf16>, vector<2x8x8xf32> -> vector<2x8x8xf32>
    "tpu.trace_stop"() : () -> ()
    %131 = tpu.concatenate %79, %96, %113, %130 in 2 : vector<2x8x8xf32>, vector<2x8x8xf32>, vector<2x8x8xf32>, vector<2x8x8xf32> -> vector<2x8x32xf32>
    %132 = vector.shape_cast %131 : vector<2x8x32xf32> to vector<16x32xf32>
    %133 = arith.truncf %132 : vector<16x32xf32> to vector<16x32xbf16>
    %c0_42 = arith.constant 0 : index
    %c0_43 = arith.constant 0 : index
    %c0_44 = arith.constant 0 : index
    %134 = vector.load %arg4[%c0_42, %c0_43, %c0_44] : memref<2x32x32xbf16, #tpu.memory_space<vmem>>, vector<1x32x32xbf16>
    %135 = vector.shape_cast %134 : vector<1x32x32xbf16> to vector<32x32xbf16>
    %cst_45 = arith.constant dense<0.000000e+00> : vector<16x32xf32>
    %136 = tpu.matmul %133, %135, %cst_45 {dimension_numbers = #tpu.dot_dimension_numbers<[1], [0], [0], [1], [0, 0, 1, 1], [], []>} : vector<16x32xbf16>, vector<32x32xbf16>, vector<16x32xf32> -> vector<16x32xf32>
    %137 = arith.mulf %136, %136 : vector<16x32xf32>
    %cst_46 = arith.constant dense<0.000000e+00> : vector<16xf32>
    %138 = vector.multi_reduction <add>, %137, %cst_46 [1] : vector<16x32xf32> to vector<16xf32>
    %139 = vector.shape_cast %138 : vector<16xf32> to vector<16x1xf32>
    %cst_47 = arith.constant 9.99999996E-13 : f32
    %140 = vector.broadcast %cst_47 : f32 to vector<16x1xf32>
    %141 = arith.maximumf %139, %140 : vector<16x1xf32>
    %142 = math.rsqrt %141 : vector<16x1xf32>
    %143 = vector.broadcast %142 : vector<16x1xf32> to vector<16x32xf32>
    %144 = arith.mulf %136, %143 : vector<16x32xf32>
    %145 = arith.subf %144, %0 : vector<16x32xf32>
    %146 = vector.broadcast %20 : vector<1x32xf32> to vector<16x32xf32>
    %147 = arith.mulf %146, %145 : vector<16x32xf32>
    %148 = arith.addf %0, %147 : vector<16x32xf32>
    %149 = arith.mulf %148, %148 : vector<16x32xf32>
    %cst_48 = arith.constant dense<0.000000e+00> : vector<16xf32>
    %150 = vector.multi_reduction <add>, %149, %cst_48 [1] : vector<16x32xf32> to vector<16xf32>
    %151 = vector.shape_cast %150 : vector<16xf32> to vector<16x1xf32>
    %cst_49 = arith.constant 9.99999996E-13 : f32
    %152 = vector.broadcast %cst_49 : f32 to vector<16x1xf32>
    %153 = arith.maximumf %151, %152 : vector<16x1xf32>
    %154 = math.rsqrt %153 : vector<16x1xf32>
    %155 = vector.broadcast %154 : vector<16x1xf32> to vector<16x32xf32>
    %156 = arith.mulf %148, %155 : vector<16x32xf32>
    %157 = arith.truncf %156 : vector<16x32xf32> to vector<16x32xbf16>
    %c0_50 = arith.constant 0 : index
    %c0_51 = arith.constant 0 : index
    %c0_52 = arith.constant 0 : index
    %158 = vector.load %arg5[%c0_50, %c0_51, %c0_52] : memref<2x32x256xbf16, #tpu.memory_space<vmem>>, vector<1x32x256xbf16>
    %159 = vector.shape_cast %158 : vector<1x32x256xbf16> to vector<32x256xbf16>
    %cst_53 = arith.constant dense<0.000000e+00> : vector<16x256xf32>
    %160 = tpu.matmul %157, %159, %cst_53 {dimension_numbers = #tpu.dot_dimension_numbers<[1], [0], [0], [1], [0, 0, 1, 1], [], []>} : vector<16x32xbf16>, vector<32x256xbf16>, vector<16x256xf32> -> vector<16x256xf32>
    %161 = vector.extract_strided_slice %160 {offsets = [0, 0], sizes = [16, 64], strides = [1, 1]} : vector<16x256xf32> to vector<16x64xf32>
    %162 = vector.broadcast %22 : vector<1x64xf32> to vector<16x64xf32>
    %163 = arith.mulf %161, %162 : vector<16x64xf32>
    %164 = vector.extract_strided_slice %160 {offsets = [0, 128], sizes = [16, 64], strides = [1, 1]} : vector<16x256xf32> to vector<16x64xf32>
    %165 = vector.broadcast %23 : vector<1x64xf32> to vector<16x64xf32>
    %166 = arith.mulf %164, %165 : vector<16x64xf32>
    %cst_54 = arith.constant 0.000000e+00 : f32
    %167 = vector.broadcast %cst_54 : f32 to vector<16x64xf32>
    %168 = arith.subf %167, %166 : vector<16x64xf32>
    %169 = math.exp %168 : vector<16x64xf32>
    %cst_55 = arith.constant 1.000000e+00 : f32
    %170 = vector.broadcast %cst_55 : f32 to vector<16x64xf32>
    %171 = arith.addf %170, %169 : vector<16x64xf32>
    %172 = tpu.reciprocal %171 {approx = true} : vector<16x64xf32> -> vector<16x64xf32>
    %173 = arith.mulf %166, %172 : vector<16x64xf32>
    %174 = arith.mulf %163, %173 : vector<16x64xf32>
    %175 = arith.truncf %174 : vector<16x64xf32> to vector<16x64xbf16>
    %c0_56 = arith.constant 0 : index
    %c0_57 = arith.constant 0 : index
    %c0_58 = arith.constant 0 : index
    %176 = vector.load %arg6[%c0_56, %c0_57, %c0_58] : memref<2x64x32xbf16, #tpu.memory_space<vmem>>, vector<1x64x32xbf16>
    %177 = vector.shape_cast %176 : vector<1x64x32xbf16> to vector<64x32xbf16>
    %cst_59 = arith.constant dense<0.000000e+00> : vector<16x32xf32>
    %178 = tpu.matmul %175, %177, %cst_59 {dimension_numbers = #tpu.dot_dimension_numbers<[1], [0], [0], [1], [0, 0, 1, 1], [], []>} : vector<16x64xbf16>, vector<64x32xbf16>, vector<16x32xf32> -> vector<16x32xf32>
    %179 = arith.mulf %178, %178 : vector<16x32xf32>
    %cst_60 = arith.constant dense<0.000000e+00> : vector<16xf32>
    %180 = vector.multi_reduction <add>, %179, %cst_60 [1] : vector<16x32xf32> to vector<16xf32>
    %181 = vector.shape_cast %180 : vector<16xf32> to vector<16x1xf32>
    %cst_61 = arith.constant 9.99999996E-13 : f32
    %182 = vector.broadcast %cst_61 : f32 to vector<16x1xf32>
    %183 = arith.maximumf %181, %182 : vector<16x1xf32>
    %184 = math.rsqrt %183 : vector<16x1xf32>
    %185 = vector.broadcast %184 : vector<16x1xf32> to vector<16x32xf32>
    %186 = arith.mulf %178, %185 : vector<16x32xf32>
    %187 = arith.subf %186, %156 : vector<16x32xf32>
    %188 = vector.broadcast %21 : vector<1x32xf32> to vector<16x32xf32>
    %189 = arith.mulf %188, %187 : vector<16x32xf32>
    %190 = arith.addf %156, %189 : vector<16x32xf32>
    %191 = arith.mulf %190, %190 : vector<16x32xf32>
    %cst_62 = arith.constant dense<0.000000e+00> : vector<16xf32>
    %192 = vector.multi_reduction <add>, %191, %cst_62 [1] : vector<16x32xf32> to vector<16xf32>
    %193 = vector.shape_cast %192 : vector<16xf32> to vector<16x1xf32>
    %cst_63 = arith.constant 9.99999996E-13 : f32
    %194 = vector.broadcast %cst_63 : f32 to vector<16x1xf32>
    %195 = arith.maximumf %193, %194 : vector<16x1xf32>
    %196 = math.rsqrt %195 : vector<16x1xf32>
    %197 = vector.broadcast %196 : vector<16x1xf32> to vector<16x32xf32>
    %198 = arith.mulf %190, %197 : vector<16x32xf32>
    %c1_64 = arith.constant 1 : index
    %c0_65 = arith.constant 0 : index
    %c0_66 = arith.constant 0 : index
    %199 = vector.load %arg7[%c1_64, %c0_65, %c0_66] : memref<2x8x128xf32, #tpu.memory_space<vmem>>, vector<1x8x128xf32>
    %200 = vector.shape_cast %199 : vector<1x8x128xf32> to vector<8x128xf32>
    %201 = vector.extract_strided_slice %200 {offsets = [0, 0], sizes = [1, 32], strides = [1, 1]} : vector<8x128xf32> to vector<1x32xf32>
    %202 = vector.extract_strided_slice %200 {offsets = [1, 0], sizes = [1, 32], strides = [1, 1]} : vector<8x128xf32> to vector<1x32xf32>
    %203 = vector.extract_strided_slice %200 {offsets = [2, 0], sizes = [1, 32], strides = [1, 1]} : vector<8x128xf32> to vector<1x32xf32>
    %204 = vector.extract_strided_slice %200 {offsets = [3, 0], sizes = [1, 64], strides = [1, 1]} : vector<8x128xf32> to vector<1x64xf32>
    %205 = vector.extract_strided_slice %200 {offsets = [4, 0], sizes = [1, 64], strides = [1, 1]} : vector<8x128xf32> to vector<1x64xf32>
    %206 = arith.truncf %198 : vector<16x32xf32> to vector<16x32xbf16>
    %c1_67 = arith.constant 1 : index
    %c0_68 = arith.constant 0 : index
    %c0_69 = arith.constant 0 : index
    %207 = vector.load %arg3[%c1_67, %c0_68, %c0_69] : memref<2x32x640xbf16, #tpu.memory_space<vmem>>, vector<1x32x640xbf16>
    %208 = vector.shape_cast %207 : vector<1x32x640xbf16> to vector<32x640xbf16>
    %cst_70 = arith.constant dense<0.000000e+00> : vector<16x640xf32>
    %209 = tpu.matmul %206, %208, %cst_70 {dimension_numbers = #tpu.dot_dimension_numbers<[1], [0], [0], [1], [0, 0, 1, 1], [], []>} : vector<16x32xbf16>, vector<32x640xbf16>, vector<16x640xf32> -> vector<16x640xf32>
    %210 = vector.extract_strided_slice %209 {offsets = [0, 0], sizes = [16, 32], strides = [1, 1]} : vector<16x640xf32> to vector<16x32xf32>
    %211 = vector.extract_strided_slice %209 {offsets = [0, 128], sizes = [16, 32], strides = [1, 1]} : vector<16x640xf32> to vector<16x32xf32>
    %212 = vector.extract_strided_slice %209 {offsets = [0, 256], sizes = [16, 32], strides = [1, 1]} : vector<16x640xf32> to vector<16x32xf32>
    %213 = vector.extract_strided_slice %209 {offsets = [0, 384], sizes = [16, 32], strides = [1, 1]} : vector<16x640xf32> to vector<16x32xf32>
    %214 = vector.extract_strided_slice %209 {offsets = [0, 512], sizes = [16, 32], strides = [1, 1]} : vector<16x640xf32> to vector<16x32xf32>
    %215 = arith.mulf %210, %6 : vector<16x32xf32>
    %216 = arith.mulf %211, %5 : vector<16x32xf32>
    %217 = arith.addf %215, %216 : vector<16x32xf32>
    %218 = arith.mulf %212, %6 : vector<16x32xf32>
    %219 = arith.mulf %213, %5 : vector<16x32xf32>
    %220 = arith.addf %218, %219 : vector<16x32xf32>
    %221 = arith.mulf %217, %217 : vector<16x32xf32>
    %cst_71 = arith.constant dense<0.000000e+00> : vector<16x32xf32>
    %222 = tpu.matmul %221, %8, %cst_71 {dimension_numbers = #tpu.dot_dimension_numbers<[1], [0], [0], [1], [0, 0, 1, 1], [], []>} : vector<16x32xf32>, vector<32x32xf32>, vector<16x32xf32> -> vector<16x32xf32>
    %cst_72 = arith.constant 9.99999996E-13 : f32
    %223 = vector.broadcast %cst_72 : f32 to vector<16x32xf32>
    %224 = arith.maximumf %222, %223 : vector<16x32xf32>
    %225 = math.rsqrt %224 : vector<16x32xf32>
    %cst_73 = arith.constant dense<0.000000e+00> : vector<16x32xf32>
    %226 = tpu.matmul %225, %10, %cst_73 {dimension_numbers = #tpu.dot_dimension_numbers<[1], [0], [0], [1], [0, 0, 1, 1], [], []>} : vector<16x32xf32>, vector<32x32xf32>, vector<16x32xf32> -> vector<16x32xf32>
    %227 = arith.mulf %217, %226 : vector<16x32xf32>
    %228 = vector.broadcast %201 : vector<1x32xf32> to vector<16x32xf32>
    %229 = arith.mulf %227, %228 : vector<16x32xf32>
    %230 = arith.mulf %220, %220 : vector<16x32xf32>
    %cst_74 = arith.constant dense<0.000000e+00> : vector<16x32xf32>
    %231 = tpu.matmul %230, %8, %cst_74 {dimension_numbers = #tpu.dot_dimension_numbers<[1], [0], [0], [1], [0, 0, 1, 1], [], []>} : vector<16x32xf32>, vector<32x32xf32>, vector<16x32xf32> -> vector<16x32xf32>
    %cst_75 = arith.constant 9.99999996E-13 : f32
    %232 = vector.broadcast %cst_75 : f32 to vector<16x32xf32>
    %233 = arith.maximumf %231, %232 : vector<16x32xf32>
    %234 = math.rsqrt %233 : vector<16x32xf32>
    %cst_76 = arith.constant dense<0.000000e+00> : vector<16x32xf32>
    %235 = tpu.matmul %234, %10, %cst_76 {dimension_numbers = #tpu.dot_dimension_numbers<[1], [0], [0], [1], [0, 0, 1, 1], [], []>} : vector<16x32xf32>, vector<32x32xf32>, vector<16x32xf32> -> vector<16x32xf32>
    %236 = arith.mulf %220, %235 : vector<16x32xf32>
    %237 = vector.broadcast %201 : vector<1x32xf32> to vector<16x32xf32>
    %238 = arith.mulf %236, %237 : vector<16x32xf32>
    %239 = vector.shape_cast %229 : vector<16x32xf32> to vector<2x8x32xf32>
    %240 = arith.truncf %239 : vector<2x8x32xf32> to vector<2x8x32xbf16>
    %241 = vector.shape_cast %238 : vector<16x32xf32> to vector<2x8x32xf32>
    %242 = arith.truncf %241 : vector<2x8x32xf32> to vector<2x8x32xbf16>
    %243 = vector.shape_cast %214 : vector<16x32xf32> to vector<2x8x32xf32>
    %244 = arith.truncf %243 : vector<2x8x32xf32> to vector<2x8x32xbf16>
    %245 = vector.extract_strided_slice %240 {offsets = [0, 0, 0], sizes = [2, 8, 8], strides = [1, 1, 1]} : vector<2x8x32xbf16> to vector<2x8x8xbf16>
    %246 = vector.extract_strided_slice %242 {offsets = [0, 0, 0], sizes = [2, 8, 8], strides = [1, 1, 1]} : vector<2x8x32xbf16> to vector<2x8x8xbf16>
    %247 = vector.extract_strided_slice %244 {offsets = [0, 0, 0], sizes = [2, 8, 8], strides = [1, 1, 1]} : vector<2x8x32xbf16> to vector<2x8x8xbf16>
    "tpu.trace_start"() <{level = 10 : i32, message = "bqd,bkd->bqk"}> : () -> ()
    %cst_77 = arith.constant dense<0.000000e+00> : vector<2x8x8xf32>
    %248 = tpu.matmul %245, %246, %cst_77 {dimension_numbers = #tpu.dot_dimension_numbers<[2], [2], [1], [1], [0, 0, 0, 1, 1, 1], [0], [0]>} : vector<2x8x8xbf16>, vector<2x8x8xbf16>, vector<2x8x8xf32> -> vector<2x8x8xf32>
    "tpu.trace_stop"() : () -> ()
    %cst_78 = arith.constant 2.82842708 : f32
    %249 = vector.broadcast %cst_78 : f32 to vector<2x8x8xf32>
    %250 = arith.mulf %248, %249 : vector<2x8x8xf32>
    %251 = vector.shape_cast %16 : vector<8x8xf32> to vector<1x8x8xf32>
    %252 = vector.broadcast %251 : vector<1x8x8xf32> to vector<2x8x8xf32>
    %253 = arith.addf %250, %252 : vector<2x8x8xf32>
    %254 = math.exp %253 : vector<2x8x8xf32>
    %cst_79 = arith.constant dense<0.000000e+00> : vector<2x8xf32>
    %255 = vector.multi_reduction <add>, %254, %cst_79 [2] : vector<2x8x8xf32> to vector<2x8xf32>
    %256 = vector.shape_cast %255 : vector<2x8xf32> to vector<2x8x1xf32>
    %257 = tpu.reciprocal %256 {approx = true} : vector<2x8x1xf32> -> vector<2x8x1xf32>
    %258 = vector.broadcast %257 : vector<2x8x1xf32> to vector<2x8x8xf32>
    %259 = arith.mulf %254, %258 : vector<2x8x8xf32>
    %260 = arith.truncf %259 : vector<2x8x8xf32> to vector<2x8x8xbf16>
    "tpu.trace_start"() <{level = 10 : i32, message = "bqk,bkd->bqd"}> : () -> ()
    %cst_80 = arith.constant dense<0.000000e+00> : vector<2x8x8xf32>
    %261 = tpu.matmul %260, %247, %cst_80 {dimension_numbers = #tpu.dot_dimension_numbers<[2], [1], [1], [2], [0, 0, 0, 1, 1, 2], [0], [0]>} : vector<2x8x8xbf16>, vector<2x8x8xbf16>, vector<2x8x8xf32> -> vector<2x8x8xf32>
    "tpu.trace_stop"() : () -> ()
    %262 = vector.extract_strided_slice %240 {offsets = [0, 0, 8], sizes = [2, 8, 8], strides = [1, 1, 1]} : vector<2x8x32xbf16> to vector<2x8x8xbf16>
    %263 = vector.extract_strided_slice %242 {offsets = [0, 0, 8], sizes = [2, 8, 8], strides = [1, 1, 1]} : vector<2x8x32xbf16> to vector<2x8x8xbf16>
    %264 = vector.extract_strided_slice %244 {offsets = [0, 0, 8], sizes = [2, 8, 8], strides = [1, 1, 1]} : vector<2x8x32xbf16> to vector<2x8x8xbf16>
    "tpu.trace_start"() <{level = 10 : i32, message = "bqd,bkd->bqk"}> : () -> ()
    %cst_81 = arith.constant dense<0.000000e+00> : vector<2x8x8xf32>
    %265 = tpu.matmul %262, %263, %cst_81 {dimension_numbers = #tpu.dot_dimension_numbers<[2], [2], [1], [1], [0, 0, 0, 1, 1, 1], [0], [0]>} : vector<2x8x8xbf16>, vector<2x8x8xbf16>, vector<2x8x8xf32> -> vector<2x8x8xf32>
    "tpu.trace_stop"() : () -> ()
    %cst_82 = arith.constant 2.82842708 : f32
    %266 = vector.broadcast %cst_82 : f32 to vector<2x8x8xf32>
    %267 = arith.mulf %265, %266 : vector<2x8x8xf32>
    %268 = vector.shape_cast %16 : vector<8x8xf32> to vector<1x8x8xf32>
    %269 = vector.broadcast %268 : vector<1x8x8xf32> to vector<2x8x8xf32>
    %270 = arith.addf %267, %269 : vector<2x8x8xf32>
    %271 = math.exp %270 : vector<2x8x8xf32>
    %cst_83 = arith.constant dense<0.000000e+00> : vector<2x8xf32>
    %272 = vector.multi_reduction <add>, %271, %cst_83 [2] : vector<2x8x8xf32> to vector<2x8xf32>
    %273 = vector.shape_cast %272 : vector<2x8xf32> to vector<2x8x1xf32>
    %274 = tpu.reciprocal %273 {approx = true} : vector<2x8x1xf32> -> vector<2x8x1xf32>
    %275 = vector.broadcast %274 : vector<2x8x1xf32> to vector<2x8x8xf32>
    %276 = arith.mulf %271, %275 : vector<2x8x8xf32>
    %277 = arith.truncf %276 : vector<2x8x8xf32> to vector<2x8x8xbf16>
    "tpu.trace_start"() <{level = 10 : i32, message = "bqk,bkd->bqd"}> : () -> ()
    %cst_84 = arith.constant dense<0.000000e+00> : vector<2x8x8xf32>
    %278 = tpu.matmul %277, %264, %cst_84 {dimension_numbers = #tpu.dot_dimension_numbers<[2], [1], [1], [2], [0, 0, 0, 1, 1, 2], [0], [0]>} : vector<2x8x8xbf16>, vector<2x8x8xbf16>, vector<2x8x8xf32> -> vector<2x8x8xf32>
    "tpu.trace_stop"() : () -> ()
    %279 = vector.extract_strided_slice %240 {offsets = [0, 0, 16], sizes = [2, 8, 8], strides = [1, 1, 1]} : vector<2x8x32xbf16> to vector<2x8x8xbf16>
    %280 = vector.extract_strided_slice %242 {offsets = [0, 0, 16], sizes = [2, 8, 8], strides = [1, 1, 1]} : vector<2x8x32xbf16> to vector<2x8x8xbf16>
    %281 = vector.extract_strided_slice %244 {offsets = [0, 0, 16], sizes = [2, 8, 8], strides = [1, 1, 1]} : vector<2x8x32xbf16> to vector<2x8x8xbf16>
    "tpu.trace_start"() <{level = 10 : i32, message = "bqd,bkd->bqk"}> : () -> ()
    %cst_85 = arith.constant dense<0.000000e+00> : vector<2x8x8xf32>
    %282 = tpu.matmul %279, %280, %cst_85 {dimension_numbers = #tpu.dot_dimension_numbers<[2], [2], [1], [1], [0, 0, 0, 1, 1, 1], [0], [0]>} : vector<2x8x8xbf16>, vector<2x8x8xbf16>, vector<2x8x8xf32> -> vector<2x8x8xf32>
    "tpu.trace_stop"() : () -> ()
    %cst_86 = arith.constant 2.82842708 : f32
    %283 = vector.broadcast %cst_86 : f32 to vector<2x8x8xf32>
    %284 = arith.mulf %282, %283 : vector<2x8x8xf32>
    %285 = vector.shape_cast %16 : vector<8x8xf32> to vector<1x8x8xf32>
    %286 = vector.broadcast %285 : vector<1x8x8xf32> to vector<2x8x8xf32>
    %287 = arith.addf %284, %286 : vector<2x8x8xf32>
    %288 = math.exp %287 : vector<2x8x8xf32>
    %cst_87 = arith.constant dense<0.000000e+00> : vector<2x8xf32>
    %289 = vector.multi_reduction <add>, %288, %cst_87 [2] : vector<2x8x8xf32> to vector<2x8xf32>
    %290 = vector.shape_cast %289 : vector<2x8xf32> to vector<2x8x1xf32>
    %291 = tpu.reciprocal %290 {approx = true} : vector<2x8x1xf32> -> vector<2x8x1xf32>
    %292 = vector.broadcast %291 : vector<2x8x1xf32> to vector<2x8x8xf32>
    %293 = arith.mulf %288, %292 : vector<2x8x8xf32>
    %294 = arith.truncf %293 : vector<2x8x8xf32> to vector<2x8x8xbf16>
    "tpu.trace_start"() <{level = 10 : i32, message = "bqk,bkd->bqd"}> : () -> ()
    %cst_88 = arith.constant dense<0.000000e+00> : vector<2x8x8xf32>
    %295 = tpu.matmul %294, %281, %cst_88 {dimension_numbers = #tpu.dot_dimension_numbers<[2], [1], [1], [2], [0, 0, 0, 1, 1, 2], [0], [0]>} : vector<2x8x8xbf16>, vector<2x8x8xbf16>, vector<2x8x8xf32> -> vector<2x8x8xf32>
    "tpu.trace_stop"() : () -> ()
    %296 = vector.extract_strided_slice %240 {offsets = [0, 0, 24], sizes = [2, 8, 8], strides = [1, 1, 1]} : vector<2x8x32xbf16> to vector<2x8x8xbf16>
    %297 = vector.extract_strided_slice %242 {offsets = [0, 0, 24], sizes = [2, 8, 8], strides = [1, 1, 1]} : vector<2x8x32xbf16> to vector<2x8x8xbf16>
    %298 = vector.extract_strided_slice %244 {offsets = [0, 0, 24], sizes = [2, 8, 8], strides = [1, 1, 1]} : vector<2x8x32xbf16> to vector<2x8x8xbf16>
    "tpu.trace_start"() <{level = 10 : i32, message = "bqd,bkd->bqk"}> : () -> ()
    %cst_89 = arith.constant dense<0.000000e+00> : vector<2x8x8xf32>
    %299 = tpu.matmul %296, %297, %cst_89 {dimension_numbers = #tpu.dot_dimension_numbers<[2], [2], [1], [1], [0, 0, 0, 1, 1, 1], [0], [0]>} : vector<2x8x8xbf16>, vector<2x8x8xbf16>, vector<2x8x8xf32> -> vector<2x8x8xf32>
    "tpu.trace_stop"() : () -> ()
    %cst_90 = arith.constant 2.82842708 : f32
    %300 = vector.broadcast %cst_90 : f32 to vector<2x8x8xf32>
    %301 = arith.mulf %299, %300 : vector<2x8x8xf32>
    %302 = vector.shape_cast %16 : vector<8x8xf32> to vector<1x8x8xf32>
    %303 = vector.broadcast %302 : vector<1x8x8xf32> to vector<2x8x8xf32>
    %304 = arith.addf %301, %303 : vector<2x8x8xf32>
    %305 = math.exp %304 : vector<2x8x8xf32>
    %cst_91 = arith.constant dense<0.000000e+00> : vector<2x8xf32>
    %306 = vector.multi_reduction <add>, %305, %cst_91 [2] : vector<2x8x8xf32> to vector<2x8xf32>
    %307 = vector.shape_cast %306 : vector<2x8xf32> to vector<2x8x1xf32>
    %308 = tpu.reciprocal %307 {approx = true} : vector<2x8x1xf32> -> vector<2x8x1xf32>
    %309 = vector.broadcast %308 : vector<2x8x1xf32> to vector<2x8x8xf32>
    %310 = arith.mulf %305, %309 : vector<2x8x8xf32>
    %311 = arith.truncf %310 : vector<2x8x8xf32> to vector<2x8x8xbf16>
    "tpu.trace_start"() <{level = 10 : i32, message = "bqk,bkd->bqd"}> : () -> ()
    %cst_92 = arith.constant dense<0.000000e+00> : vector<2x8x8xf32>
    %312 = tpu.matmul %311, %298, %cst_92 {dimension_numbers = #tpu.dot_dimension_numbers<[2], [1], [1], [2], [0, 0, 0, 1, 1, 2], [0], [0]>} : vector<2x8x8xbf16>, vector<2x8x8xbf16>, vector<2x8x8xf32> -> vector<2x8x8xf32>
    "tpu.trace_stop"() : () -> ()
    %313 = tpu.concatenate %261, %278, %295, %312 in 2 : vector<2x8x8xf32>, vector<2x8x8xf32>, vector<2x8x8xf32>, vector<2x8x8xf32> -> vector<2x8x32xf32>
    %314 = vector.shape_cast %313 : vector<2x8x32xf32> to vector<16x32xf32>
    %315 = arith.truncf %314 : vector<16x32xf32> to vector<16x32xbf16>
    %c1_93 = arith.constant 1 : index
    %c0_94 = arith.constant 0 : index
    %c0_95 = arith.constant 0 : index
    %316 = vector.load %arg4[%c1_93, %c0_94, %c0_95] : memref<2x32x32xbf16, #tpu.memory_space<vmem>>, vector<1x32x32xbf16>
    %317 = vector.shape_cast %316 : vector<1x32x32xbf16> to vector<32x32xbf16>
    %cst_96 = arith.constant dense<0.000000e+00> : vector<16x32xf32>
    %318 = tpu.matmul %315, %317, %cst_96 {dimension_numbers = #tpu.dot_dimension_numbers<[1], [0], [0], [1], [0, 0, 1, 1], [], []>} : vector<16x32xbf16>, vector<32x32xbf16>, vector<16x32xf32> -> vector<16x32xf32>
    %319 = arith.mulf %318, %318 : vector<16x32xf32>
    %cst_97 = arith.constant dense<0.000000e+00> : vector<16xf32>
    %320 = vector.multi_reduction <add>, %319, %cst_97 [1] : vector<16x32xf32> to vector<16xf32>
    %321 = vector.shape_cast %320 : vector<16xf32> to vector<16x1xf32>
    %cst_98 = arith.constant 9.99999996E-13 : f32
    %322 = vector.broadcast %cst_98 : f32 to vector<16x1xf32>
    %323 = arith.maximumf %321, %322 : vector<16x1xf32>
    %324 = math.rsqrt %323 : vector<16x1xf32>
    %325 = vector.broadcast %324 : vector<16x1xf32> to vector<16x32xf32>
    %326 = arith.mulf %318, %325 : vector<16x32xf32>
    %327 = arith.subf %326, %198 : vector<16x32xf32>
    %328 = vector.broadcast %202 : vector<1x32xf32> to vector<16x32xf32>
    %329 = arith.mulf %328, %327 : vector<16x32xf32>
    %330 = arith.addf %198, %329 : vector<16x32xf32>
    %331 = arith.mulf %330, %330 : vector<16x32xf32>
    %cst_99 = arith.constant dense<0.000000e+00> : vector<16xf32>
    %332 = vector.multi_reduction <add>, %331, %cst_99 [1] : vector<16x32xf32> to vector<16xf32>
    %333 = vector.shape_cast %332 : vector<16xf32> to vector<16x1xf32>
    %cst_100 = arith.constant 9.99999996E-13 : f32
    %334 = vector.broadcast %cst_100 : f32 to vector<16x1xf32>
    %335 = arith.maximumf %333, %334 : vector<16x1xf32>
    %336 = math.rsqrt %335 : vector<16x1xf32>
    %337 = vector.broadcast %336 : vector<16x1xf32> to vector<16x32xf32>
    %338 = arith.mulf %330, %337 : vector<16x32xf32>
    %339 = arith.truncf %338 : vector<16x32xf32> to vector<16x32xbf16>
    %c1_101 = arith.constant 1 : index
    %c0_102 = arith.constant 0 : index
    %c0_103 = arith.constant 0 : index
    %340 = vector.load %arg5[%c1_101, %c0_102, %c0_103] : memref<2x32x256xbf16, #tpu.memory_space<vmem>>, vector<1x32x256xbf16>
    %341 = vector.shape_cast %340 : vector<1x32x256xbf16> to vector<32x256xbf16>
    %cst_104 = arith.constant dense<0.000000e+00> : vector<16x256xf32>
    %342 = tpu.matmul %339, %341, %cst_104 {dimension_numbers = #tpu.dot_dimension_numbers<[1], [0], [0], [1], [0, 0, 1, 1], [], []>} : vector<16x32xbf16>, vector<32x256xbf16>, vector<16x256xf32> -> vector<16x256xf32>
    %343 = vector.extract_strided_slice %342 {offsets = [0, 0], sizes = [16, 64], strides = [1, 1]} : vector<16x256xf32> to vector<16x64xf32>
    %344 = vector.broadcast %204 : vector<1x64xf32> to vector<16x64xf32>
    %345 = arith.mulf %343, %344 : vector<16x64xf32>
    %346 = vector.extract_strided_slice %342 {offsets = [0, 128], sizes = [16, 64], strides = [1, 1]} : vector<16x256xf32> to vector<16x64xf32>
    %347 = vector.broadcast %205 : vector<1x64xf32> to vector<16x64xf32>
    %348 = arith.mulf %346, %347 : vector<16x64xf32>
    %cst_105 = arith.constant 0.000000e+00 : f32
    %349 = vector.broadcast %cst_105 : f32 to vector<16x64xf32>
    %350 = arith.subf %349, %348 : vector<16x64xf32>
    %351 = math.exp %350 : vector<16x64xf32>
    %cst_106 = arith.constant 1.000000e+00 : f32
    %352 = vector.broadcast %cst_106 : f32 to vector<16x64xf32>
    %353 = arith.addf %352, %351 : vector<16x64xf32>
    %354 = tpu.reciprocal %353 {approx = true} : vector<16x64xf32> -> vector<16x64xf32>
    %355 = arith.mulf %348, %354 : vector<16x64xf32>
    %356 = arith.mulf %345, %355 : vector<16x64xf32>
    %357 = arith.truncf %356 : vector<16x64xf32> to vector<16x64xbf16>
    %c1_107 = arith.constant 1 : index
    %c0_108 = arith.constant 0 : index
    %c0_109 = arith.constant 0 : index
    %358 = vector.load %arg6[%c1_107, %c0_108, %c0_109] : memref<2x64x32xbf16, #tpu.memory_space<vmem>>, vector<1x64x32xbf16>
    %359 = vector.shape_cast %358 : vector<1x64x32xbf16> to vector<64x32xbf16>
    %cst_110 = arith.constant dense<0.000000e+00> : vector<16x32xf32>
    %360 = tpu.matmul %357, %359, %cst_110 {dimension_numbers = #tpu.dot_dimension_numbers<[1], [0], [0], [1], [0, 0, 1, 1], [], []>} : vector<16x64xbf16>, vector<64x32xbf16>, vector<16x32xf32> -> vector<16x32xf32>
    %361 = arith.mulf %360, %360 : vector<16x32xf32>
    %cst_111 = arith.constant dense<0.000000e+00> : vector<16xf32>
    %362 = vector.multi_reduction <add>, %361, %cst_111 [1] : vector<16x32xf32> to vector<16xf32>
    %363 = vector.shape_cast %362 : vector<16xf32> to vector<16x1xf32>
    %cst_112 = arith.constant 9.99999996E-13 : f32
    %364 = vector.broadcast %cst_112 : f32 to vector<16x1xf32>
    %365 = arith.maximumf %363, %364 : vector<16x1xf32>
    %366 = math.rsqrt %365 : vector<16x1xf32>
    %367 = vector.broadcast %366 : vector<16x1xf32> to vector<16x32xf32>
    %368 = arith.mulf %360, %367 : vector<16x32xf32>
    %369 = arith.subf %368, %338 : vector<16x32xf32>
    %370 = vector.broadcast %203 : vector<1x32xf32> to vector<16x32xf32>
    %371 = arith.mulf %370, %369 : vector<16x32xf32>
    %372 = arith.addf %338, %371 : vector<16x32xf32>
    %373 = arith.mulf %372, %372 : vector<16x32xf32>
    %cst_113 = arith.constant dense<0.000000e+00> : vector<16xf32>
    %374 = vector.multi_reduction <add>, %373, %cst_113 [1] : vector<16x32xf32> to vector<16xf32>
    %375 = vector.shape_cast %374 : vector<16xf32> to vector<16x1xf32>
    %cst_114 = arith.constant 9.99999996E-13 : f32
    %376 = vector.broadcast %cst_114 : f32 to vector<16x1xf32>
    %377 = arith.maximumf %375, %376 : vector<16x1xf32>
    %378 = math.rsqrt %377 : vector<16x1xf32>
    %379 = vector.broadcast %378 : vector<16x1xf32> to vector<16x32xf32>
    %380 = arith.mulf %372, %379 : vector<16x32xf32>
    %381 = arith.truncf %380 : vector<16x32xf32> to vector<16x32xbf16>
    %c0_115 = arith.constant 0 : index
    %c0_116 = arith.constant 0 : index
    %382 = vector.load %arg8[%c0_115, %c0_116] : memref<32x128xbf16, #tpu.memory_space<vmem>>, vector<32x128xbf16>
    %cst_117 = arith.constant dense<0.000000e+00> : vector<16x128xf32>
    %383 = tpu.matmul %381, %382, %cst_117 {dimension_numbers = #tpu.dot_dimension_numbers<[1], [0], [0], [1], [0, 0, 1, 1], [], []>} : vector<16x32xbf16>, vector<32x128xbf16>, vector<16x128xf32> -> vector<16x128xf32>
    %c0_118 = arith.constant 0 : index
    %c0_119 = arith.constant 0 : index
    %384 = vector.load %arg9[%c0_118, %c0_119] : memref<16x128xf32, #tpu.memory_space<vmem>>, vector<16x128xf32>
    tpu.vector_store %arg9[%c0_118, %c0_119], %383 {strides = array<i32>} : memref<16x128xf32, #tpu.memory_space<vmem>>, vector<16x128xf32>,
    return
  }
}

</mosaic_0001>

<bundles_post_ra>
// kernel: tpu_custom_call.1
= control target key start
LH: loop header
LB: loop body
LE: loop exit
PB: predicated region body
PF: predicated region fallthrough
CT: control target
= control target key end

     0   :  { %14 = vsyncpa [#allocation3], 0  ;;  %s5597_s0 = inlined_call_operand.hbm [shape: f32[16,32], index: 0, kind: input, shape index: {}]   ;;  %s5598_s1 = inlined_call_operand.hbm [shape: f32[2,8,32], index: 1, kind: input, shape index: {}]   ;;  %s5599_s2 = inlined_call_operand.vmem [shape: f32[2,32,32], index: 2, kind: input, shape index: {}]   ;;  %s5600_s3 = inlined_call_operand.hbm [shape: bf16[2,32,640], index: 3, kind: input, shape index: {}]   ;;  %s5601_s4 = inlined_call_operand.vmem [shape: bf16[2,32,32], index: 4, kind: input, shape index: {}]   ;;  %s5602_s5 = inlined_call_operand.hbm [shape: bf16[2,32,256], index: 5, kind: input, shape index: {}]   ;;  %s5603_s6 = inlined_call_operand.vmem [shape: bf16[2,64,32], index: 6, kind: input, shape index: {}]   ;;  %s5604_s7 = inlined_call_operand.vmem [shape: f32[2,8,128], index: 7, kind: input, shape index: {}]   ;;  %s5605_s8 = inlined_call_operand.hbm [shape: bf16[32,128], index: 8, kind: input, shape index: {}]   ;;  %s5606_s9 = inlined_call_operand.hbm [shape: f32[16,128], index: 9, kind: output, shape index: {}]  }
   0x1   :  { %15 = vsyncpa [#allocation6], 0 }
   0x2   :  { %16 = vsyncpa [#allocation9], 0 }
   0x3   :  { %17 = vsyncpa [#allocation4], 0  ;;  %s4779_s30 = smov [#allocation5]   ;;  %s4780_s11 = smov [#allocation8]  }
   0x4   :  { %s35_s10 = sshll.u32 %s4779_s30, 4  ;;  %s63_s12 = sshll.u32 %s4780_s11, 4  ;;  %s36_s10 = int_to_ptr.vmem [resolvable:$true] %s35_s10  ;;  %s4850_s12 = int_to_ptr.vmem [resolvable:$true] %s63_s12 }
   0x5   :  { %s4639_s15 = scalar_lea.hbm %s5598_s1, 256 }
   0x6   :  { %p4640_p0 = scmp.ne.s32.totalorder %s5598_s1, %s4639_s15  ;;  %p4643_p1 = scmp.lt.u32.totalorder %s4639_s15, %s5598_s1 }
   0x8   :  { %p4645_p2 = pnand %p4643_p1, %p4640_p0 }
   0xa   :  { %4648 = shalt.err (!%p4645_p2)
}
   0xb   :  { %s4649_s20 = scalar_lea.vmem %s36_s10, 256  ;;  %p4654_p4 = scmp.lt.s32.totalorder %s36_s10, %s36_s10 }
   0xc   :  { %p4650_p3 = scmp.ne.s32.totalorder %s36_s10, %s4649_s20  ;;  %p4655_p5 = scmp.lt.s32.totalorder %s4649_s20, %s4649_s20 }
   0xe   :  { %p4656_p6 = por %p4655_p5, %p4654_p4 }
  0x10   :  { %p4657_p7 = pnand %p4656_p6, %p4650_p3 }
  0x12   :  { %4660 = shalt.err (!%p4657_p7)
}
  0x13   :  { %s4781_s21 = smov 128   ;;  %s4782_s22 = smov 8  }
  0x14   :  { %41 = dma.hbm_to_vmem [thread:$0]  %s5598_s1, 256, %s36_s10, [#allocation6], %s4781_s21, %s4781_s21, %s4782_s22  }
  0x15   :  { %s4661_s27 = scalar_lea.hbm %s5602_s5, 1024 }
  0x16   :  { %p4662_p8 = scmp.ne.s32.totalorder %s5602_s5, %s4661_s27  ;;  %p4665_p9 = scmp.lt.u32.totalorder %s4661_s27, %s5602_s5 }
  0x18   :  { %p4667_p10 = pnand %p4665_p9, %p4662_p8 }
  0x1a   :  { %4670 = shalt.err (!%p4667_p10)
}
  0x1b   :  { %s4671_s13 = scalar_lea.vmem %s4850_s12, 1024  ;;  %p4676_p12 = scmp.lt.s32.totalorder %s4850_s12, %s4850_s12 }
  0x1c   :  { %p4672_p11 = scmp.ne.s32.totalorder %s4850_s12, %s4671_s13  ;;  %p4677_p13 = scmp.lt.s32.totalorder %s4671_s13, %s4671_s13 }
  0x1e   :  { %p4678_p0 = por %p4677_p13, %p4676_p12 }
  0x20   :  { %p4679_p1 = pnand %p4678_p0, %p4672_p11 }
  0x22   :  { %4682 = shalt.err (!%p4679_p1)
}
  0x23   :  { %69 = dma.hbm_to_vmem [thread:$0]  %s5602_s5, 1024, %s4850_s12, [#allocation9], %s4781_s21, %s4781_s21, %s4782_s22  }
  0x24   :  { %s4783_s14 = smov [#allocation2]   ;;  %s4784_s16 = smov [#allocation7]  }
  0x25   :  { %s23_s15 = sshll.u32 %s4783_s14, 4  ;;  %s49_s17 = sshll.u32 %s4784_s16, 4  ;;  %s24_s15 = int_to_ptr.vmem [resolvable:$true] %s23_s15  ;;  %s4887_s17 = int_to_ptr.vmem [resolvable:$true] %s49_s17 }
  0x26   :  { %s4683_s20 = scalar_lea.hbm %s5597_s0, 256 }
  0x27   :  { %p4684_p2 = scmp.ne.s32.totalorder %s5597_s0, %s4683_s20  ;;  %p4687_p3 = scmp.lt.u32.totalorder %s4683_s20, %s5597_s0 }
  0x29   :  { %p4689_p4 = pnand %p4687_p3, %p4684_p2 }
  0x2b   :  { %4692 = shalt.err (!%p4689_p4)
}
  0x2c   :  { %s4693_s5 = scalar_lea.vmem %s24_s15, 256  ;;  %p4698_p6 = scmp.lt.s32.totalorder %s24_s15, %s24_s15 }
  0x2d   :  { %p4694_p5 = scmp.ne.s32.totalorder %s24_s15, %s4693_s5  ;;  %p4699_p7 = scmp.lt.s32.totalorder %s4693_s5, %s4693_s5 }
  0x2f   :  { %p4700_p8 = por %p4699_p7, %p4698_p6 }
  0x31   :  { %p4701_p9 = pnand %p4700_p8, %p4694_p5 }
  0x33   :  { %4704 = shalt.err (!%p4701_p9)
}
  0x34   :  { %29 = dma.hbm_to_vmem [thread:$0]  %s5597_s0, 256, %s24_s15, [#allocation3], %s4781_s21, %s4781_s21, %s4782_s22  }
  0x35   :  { %s4705_s30 = scalar_lea.hbm %s5600_s3, 2560 }
  0x36   :  { %p4706_p10 = scmp.ne.s32.totalorder %s5600_s3, %s4705_s30  ;;  %p4709_p11 = scmp.lt.u32.totalorder %s4705_s30, %s5600_s3 }
  0x38   :  { %p4711_p12 = pnand %p4709_p11, %p4706_p10 }
  0x3a   :  { %4714 = shalt.err (!%p4711_p12)
}
  0x3b   :  { %s4715_s14 = scalar_lea.vmem %s4887_s17, 2560  ;;  %p4720_p0 = scmp.lt.s32.totalorder %s4887_s17, %s4887_s17 }
  0x3c   :  { %p4716_p13 = scmp.ne.s32.totalorder %s4887_s17, %s4715_s14  ;;  %p4721_p1 = scmp.lt.s32.totalorder %s4715_s14, %s4715_s14 }
  0x3e   :  { %p4722_p2 = por %p4721_p1, %p4720_p0 }
  0x40   :  { %p4723_p3 = pnand %p4722_p2, %p4716_p13 }
  0x42   :  { %4726 = shalt.err (!%p4723_p3)
}
  0x43   :  { %s4785_s0 = smov 320   ;;  %s4786_s15 = smov 20  }
  0x44   :  { %55 = dma.hbm_to_vmem [thread:$0]  %s5600_s3, 2560, %s4887_s17, [#allocation6], %s4785_s0, %s4785_s0, %s4786_s15  }
  0x45   :  { %s4787_s19 = smov [#allocation10]   ;;  %s4727_s25 = scalar_lea.hbm %s5605_s8, 256 }
  0x46   :  { %s79_s20 = sshll.u32 %s4787_s19, 4  ;;  %p4728_p4 = scmp.ne.s32.totalorder %s5605_s8, %s4727_s25  ;;  %s80_s20 = int_to_ptr.vmem [resolvable:$true] %s79_s20 }
  0x47   :  { %p4731_p5 = scmp.lt.u32.totalorder %s4727_s25, %s5605_s8 }
  0x49   :  { %p4733_p6 = pnand %p4731_p5, %p4728_p4 }
  0x4b   :  { %4736 = shalt.err (!%p4733_p6)
}
  0x4c   :  { %s4737_s28 = scalar_lea.vmem %s80_s20, 256  ;;  %p4742_p8 = scmp.lt.s32.totalorder %s80_s20, %s80_s20 }
  0x4d   :  { %p4738_p7 = scmp.ne.s32.totalorder %s80_s20, %s4737_s28  ;;  %p4743_p9 = scmp.lt.s32.totalorder %s4737_s28, %s4737_s28 }
  0x4f   :  { %p4744_p10 = por %p4743_p9, %p4742_p8 }
  0x51   :  { %p4745_p11 = pnand %p4744_p10, %p4738_p7 }
  0x53   :  { %4748 = shalt.err (!%p4745_p11)
}
  0x54   :  { %s4788_s3 = smov 64   ;;  %s4789_s17 = smov 4  }
  0x55   :  { %85 = dma.hbm_to_vmem [thread:$0]  %s5605_s8, 256, %s80_s20, [#allocation9], %s4788_s3, %s4788_s3, %s4789_s17  }
  0x56   :  { %4771 = dma.done.wait [#allocation3], 256  }
  0x57   :  { %4772 = vsyncadd [#allocation3], 4294967040 }
  0x58   :  { %4773 = dma.done.wait [#allocation6], 2816  }
  0x59   :  { %4774 = vsyncadd [#allocation6], 4294964480 }
  0x5a   :  { %4775 = dma.done.wait [#allocation9], 1280  }
  0x5b   :  { %4776 = vsyncadd [#allocation9], 4294966016  ;;  %v4790_v0 = vmov 0   ;;  %v4453_v1 = vld [vmem:[#allocation7 + $0x4] ss:$20 sps:$4 sm:$0xff]   ;;  %v103_v8 = vld [vmem:[#allocation2 + $0x8] sm:$0xff] }
  0x5c   :  { %224 = vmatprep.mubr.bf16.mxu0 %v4790_v0  ;;  %267 = vmatprep.mubr.bf16.mxu1 %v4790_v0  ;;  %v4455_v2 = vld [vmem:[#allocation7] ss:$20 sps:$4 sm:$0xff]   ;;  %v4460_v5 = vld [vmem:[#allocation7 + $0x28] ss:$20 sps:$4 sm:$0xff]   ;;  %vm188_vm0 = vcmask 261120   ;;  %v4791_v19 = vmov 0.0  }
  0x5d   :  { %192 = vmatprep.subr.bf16.mxu0 %v4453_v1  ;;  %v4456_v3 = vld [vmem:[#allocation7 + $0x2c] ss:$20 sps:$4 sm:$0xff]   ;;  %v4461_v6 = vld [vmem:[#allocation7 + $0x8] ss:$20 sps:$4 sm:$0xff]   ;;  %v4464_v11 = vld [vmem:[#allocation7 + $0x30] ss:$20 sps:$4 sm:$0xff]  }
  0x5e   :  { %193 = vmatpush1.bf16.msra.mxu0 %v4455_v2  ;;  %v4458_v4 = vld [vmem:[#allocation7 + $0xc] ss:$20 sps:$4 sm:$0xff]   ;;  %v4462_v9 = vld [vmem:[#allocation7 + $0x34] ss:$20 sps:$4 sm:$0xff]   ;;  %v110_v16 = vld [vmem:[%s5599_s2 + $0x18] sm:$0xff]  ;;  %vm4792_vm1 = vmmov 0  }
  0x5f   :  { %194 = vmatprep.subr.bf16.mxu0 %v4456_v3  ;;  %v102_v7 = vld [vmem:[#allocation2] sm:$0xff]  ;;  %235 = vmatprep.subr.bf16.mxu1 %v4458_v4  ;;  %v108_v13 = vld [vmem:[%s5599_s2 + $0x8] sm:$0xff]  ;;  %v109_v15 = vld [vmem:[%s5599_s2 + $0x10] sm:$0xff]  ;;  %vm685_vm2 = vcmask 64512   ;;  %s4793_s12 = smov 120   ;;  %vm801_vm3 = vcmask 1043456  }
  0x60   :  { %236 = vmatpush1.bf16.msra.mxu1 %v4461_v6  ;;  %v4935_v10 = vpack.c.bf16 %v103_v8, %v102_v7  ;;  %v107_v12 = vld [vmem:[%s5599_s2] sm:$0xff]  ;;  %v4957_v17 = vpack.c.bf16 %v110_v16, %v109_v15  ;;  %v106_v20 = vld [vmem:[#allocation5 + $0x8] sm:$0xff]  ;;  %v104_v21 = vld [vmem:[#allocation5] sm:$0xff]  ;;  %v116_v6 = vlaneseq  ;;  %s4794_s27 = smov 112   ;;  %s4796_s28 = smov 104   ;;  %vm1571_vm5 = vcmask 130048  }
  0x61   :  { %237 = vmatprep.subr.bf16.mxu1 %v4462_v9  ;;  %v4947_v14 = vpack.c.bf16 %v108_v13, %v107_v12  ;;  %v4465_v18 = vld [vmem:[#allocation7 + $0x10] ss:$20 sps:$4 sm:$0xff]   ;;  %v4466_v46 = vld [vmem:[#allocation7 + $0x38] ss:$20 sps:$4 sm:$0xff]   ;;  %s4797_s3 = smov 16   ;;  %s4798_s11 = smov 24  }
  0x62   :  { %195 = vmatpush1.bf16.msra.mxu0 %v4460_v5  ;;  %v3737_v47 = vld [vmem:[%s5599_s2 + $0x20] sm:$0xff]  ;;  %v3738_v48 = vld [vmem:[%s5599_s2 + $0x28] sm:$0xff]  ;;  %v3739_v50 = vld [vmem:[%s5599_s2 + $0x30] sm:$0xff]  ;;  %v5025_v8 = vshrl.u32 %v116_v6, 7  ;;  %vm1574_vm6 = vcmask 195584   ;;  %vm1806_vm7 = vcmask 523264  }
  0x63   :  { %3994 = vmatprep.subr.bf16.mxu0 %v4791_v19  ;;  %v4996_v49 = vpack.c.bf16 %v3738_v48, %v3737_v47  ;;  %v3740_v51 = vld [vmem:[%s5599_s2 + $0x38] sm:$0xff] }
  0x64   :  { %238 = vmatpush1.bf16.msra.mxu1 %v4464_v11  ;;  %v5010_v52 = vpack.c.bf16 %v3740_v51, %v3739_v50  ;;  %v5031_v11 = vld [vmem:[%s5604_s7] sm:$0xff] }
  0x65   :  { %3751 = vmatmul.mubr.msk.bf16.vlgmr.msra.gmra.mrb[0].mxu0 %vm188_vm0, %v4935_v10  ;;  %4339 = vmatprep.subr.bf16.mxu1 %v4947_v14 }
  0x66   :  { %3995 = vmatpush3.bf16.msra.mxu0 %v4465_v18  ;;  %3998 = vmatprep.mubr.msk.bf16.mxu0 %vm4792_vm1, %v4791_v19 }
  0x67   :  { %3752 = vmatmul.mubr.msk.bf16.vlgmr.msra.gmra.mrb[0].mxu1 %vm188_vm0, %v4935_v10  ;;  %3996 = vmatprep.subr.bf16.mxu0 %v4791_v19 }
  0x68   :  { %4341 = vmatpush3.bf16.msra.mxu1 %v4947_v14 }
  0x69   :  { %4343 = vmatprep.subr.bf16.mxu1 %v4957_v17 }
  0x6a   :  { %3997 = vmatpush3.bf16.msra.mxu0 %v4466_v46 }
  0x6b   :  { %4347 = vmatprep.subr.bf16.mxu0 %v4996_v49 }
  0x6c   :  { %4345 = vmatpush3.bf16.msra.mxu1 %v4957_v17 }
  0x6d   :  { %4355 = vmatprep.subr.bf16.mxu1 %v4947_v14  ;;  %3999 = vmatmul.mubr.msk.bf16.vlgmr.msra.gmra.mrb[4].mxu0 %vm188_vm0, %v4935_v10  ;;  %v503_v10 = vsub.s32 0, %v5025_v8 }
  0x6e   :  { %4349 = vmatpush3.bf16.msra.mxu0 %v4996_v49 }
  0x6f   :  { %4351 = vmatprep.subr.bf16.mxu0 %v5010_v52  ;;  %v504_v13 = vrot.slane %v5031_v11, %v503_v10 }
  0x72   :  { %4353 = vmatpush3.bf16.msra.mxu0 %v5010_v52 }
  0x73   :  { %4363 = vmatprep.subr.bf16.mxu0 %v4996_v49 }
 0x138   :  { %v226_v22 = vpop.f32.mrb[0].mxu0 }
 0x139   :  { %v319_v23 = vmul.f32 %v226_v22, %v106_v20  ;;  %v228_v24 = vpop.f32.mrb[1].mxu0 }
 0x13a   :  { %v321_v25 = vmul.f32 %v228_v24, %v104_v21  ;;  %v230_v26 = vpop.f32.mrb[2].mxu0  ;;  %v269_v29 = vpop.f32.mrb[0].mxu1 }
 0x13b   :  { %v320_v27 = vmul.f32 %v230_v26, %v106_v20  ;;  %v232_v28 = vpop.f32.mrb[3].mxu0  ;;  %v325_v32 = vmul.f32 %v269_v29, %v106_v20  ;;  %v271_v33 = vpop.f32.mrb[1].mxu1 }
 0x13c   :  { %v4964_v30 = vadd.f32 %v321_v25, %v319_v23  ;;  %v322_v31 = vmul.f32 %v232_v28, %v104_v21  ;;  %v327_v34 = vmul.f32 %v271_v33, %v104_v21  ;;  %v273_v35 = vpop.f32.mrb[2].mxu1 }
 0x13d   :  { %v326_v38 = vmul.f32 %v273_v35, %v106_v20  ;;  %v275_v39 = vpop.f32.mrb[3].mxu1 }
 0x13e   :  { %v331_v36 = vmul.f32 %v4964_v30, %v4964_v30  ;;  %v4968_v37 = vadd.f32 %v322_v31, %v320_v27  ;;  %v4970_v40 = vadd.f32 %v327_v34, %v325_v32  ;;  %v328_v41 = vmul.f32 %v275_v39, %v104_v21 }
 0x140   :  { %v332_v42 = vmul.f32 %v4968_v37, %v4968_v37  ;;  %4010 = vmatprep.mubr.msk.f32.mxu1 %vm188_vm0, %v331_v36  ;;  %v507_v43 = vmul.f32 %v4970_v40, %v4970_v40  ;;  %v4977_v44 = vadd.f32 %v328_v41, %v326_v38  ;;  %v312_v2 = vpop.f32.mrb[4].mxu0  ;;  %v119_v36 = vand.u32 127, %v116_v6 }
 0x141   :  { %v4000_v3 = vpop.f32.mrb[5].mxu0  ;;  %v5056_v31 = vpack.c.bf16 %v312_v2, %v312_v2 }
 0x142   :  { %4011 = vmatmul.mubr.msk.f32.vlgmr.msra.gmra.mrb[4].mxu1 %vm188_vm0, %v332_v42  ;;  %v508_v45 = vmul.f32 %v4977_v44, %v4977_v44  ;;  %v315_v4 = vpop.f32.mrb[6].mxu0  ;;  %vm120_vm4 = vcmp.ge.s32.totalorder %v5025_v8, %v119_v36 }
 0x143   :  { %4357 = vmatpush3.bf16.msra.mxu1 %v4947_v14  ;;  %4032 = vmatprep.mubr.msk.f32.mxu1 %vm188_vm0, %v507_v43  ;;  %v4001_v5 = vpop.f32.mrb[7].mxu0  ;;  %v5052_v29 = vpack.c.bf16 %v315_v4, %v315_v4  ;;  %v803_v35 = vsel %vm801_vm3, %v5056_v31, 0 }
 0x144   :  { %4359 = vmatprep.subr.bf16.mxu1 %v4957_v17 }
 0x145   :  { %v849_v34 = vsel %vm801_vm3, %v5052_v29, 0 }
 0x147   :  { %4361 = vmatpush3.bf16.msra.mxu1 %v4957_v17 }
 0x148   :  { %4046 = vmatprep.subr.bf16.mxu1 %v4791_v19 }
 0x14a   :  { %4033 = vmatmul.mubr.msk.f32.vlgmr.msra.gmra.mrb[6].mxu1 %vm188_vm0, %v508_v45 }
 0x14b   :  { %4048 = vmatprep.mubr.msk.bf16.mxu1 %vm4792_vm1, %v4791_v19 }
 0x215   :  { %v4012_v53 = vpop.f32.mrb[4].mxu1 }
 0x216   :  { %v415_v54 = vmax.f32 %v4012_v53, 1e-12  ;;  %v405_v55 = vpop.f32.mrb[5].mxu1 }
 0x217   :  { %v414_v56 = vmax.f32 %v405_v55, 1e-12 }
 0x219   :  { %4507 = vrsqrt.f32 %v414_v56 }
 0x21a   :  { %4509 = vrsqrt.f32 %v415_v54 }
 0x21d   :  { %v4034_v57 = vpop.f32.mrb[6].mxu1 }
 0x21e   :  { %v591_v58 = vmax.f32 %v4034_v57, 1e-12  ;;  %v581_v59 = vpop.f32.mrb[7].mxu1 }
 0x21f   :  { %v590_v60 = vmax.f32 %v581_v59, 1e-12 }
 0x221   :  { %4511 = vrsqrt.f32 %v590_v60 }
 0x222   :  { %4513 = vrsqrt.f32 %v591_v58 }
 0x223   :  { %v4508_v61 = vpop.eup %4507 }
 0x224   :  { %v4510_v62 = vpop.eup %4509  ;;  %4021 = vmatprep.mubr.msk.f32.mxu0 %vm188_vm0, %v4508_v61 }
 0x225   :  { %4022 = vmatmul.mubr.msk.f32.vlgmr.msra.gmra.mrb[8].mxu0 %vm188_vm0, %v4510_v62 }
 0x226   :  { %4365 = vmatpush3.bf16.msra.mxu0 %v4996_v49 }
 0x227   :  { %4367 = vmatprep.subr.bf16.mxu0 %v5010_v52 }
 0x22a   :  { %4369 = vmatpush3.bf16.msra.mxu0 %v5010_v52 }
 0x22b   :  { %v4512_v63 = vpop.eup %4511  ;;  %4052 = vmatprep.subr.bf16.mxu0 %v4791_v19 }
 0x22c   :  { %v4514_v1 = vpop.eup %4513  ;;  %4043 = vmatprep.mubr.msk.f32.mxu0 %vm188_vm0, %v4512_v63 }
 0x22d   :  { %4044 = vmatmul.mubr.msk.f32.vlgmr.msra.gmra.mrb[10].mxu0 %vm188_vm0, %v4514_v1 }
 0x22e   :  { %4054 = vmatprep.mubr.msk.bf16.mxu0 %vm4792_vm1, %v4791_v19 }
 0x2f8   :  { %v4023_v7 = vpop.f32.mrb[8].mxu0 }
 0x2f9   :  { %v490_v9 = vpop.f32.mrb[9].mxu0  ;;  %v500_v22 = vmul.f32 %v4023_v7, %v4968_v37  ;;  %v4795_v37 = vmov -1e+30  }
 0x2fa   :  { %v499_v25 = vmul.f32 %v490_v9, %v4964_v30  ;;  %v5085_v38 = vsel %vm120_vm4, 0.0, %v4795_v37 }
 0x2fb   :  { %v506_v28 = vmul.f32 %v504_v13, %v500_v22 }
 0x2fc   :  { %v505_v30 = vmul.f32 %v504_v13, %v499_v25 }
 0x2fd   :  { %v5058_v32 = vpack.c.bf16 %v506_v28, %v506_v28 }
 0x2fe   :  { %v5060_v33 = vpack.c.bf16 %v505_v30, %v505_v30 }
 0x300   :  { %v4045_v12 = vpop.f32.mrb[10].mxu0 }
 0x301   :  { %v676_v15 = vmul.f32 %v4045_v12, %v4977_v44  ;;  %v666_v16 = vpop.f32.mrb[11].mxu0 }
 0x302   :  { %v675_v18 = vmul.f32 %v666_v16, %v4970_v40 }
 0x303   :  { %v678_v20 = vmul.f32 %v676_v15, %v504_v13 }
 0x304   :  { %v677_v21 = vmul.f32 %v675_v18, %v504_v13 }
 0x305   :  { %v5039_v23 = vpack.c.bf16 %v678_v20, %v678_v20 }
 0x306   :  { %v5041_v24 = vpack.c.bf16 %v677_v21, %v677_v21 }
 0x307   :  { %v736_v26 = vsel %vm685_vm2, %v5039_v23, 0 }
 0x308   :  { %4053 = vmatpush3.bf16.xpose.msra.mxu0 %v736_v26  ;;  %895 = vrot.lane.b32.xlu1 %v5041_v24, %s4793_s12  ;;  %v690_v27 = vsel %vm685_vm2, %v5041_v24, 0 }
 0x309   :  { %4047 = vmatpush3.bf16.xpose.msra.mxu1 %v690_v27  ;;  %4064 = vmatprep.subr.bf16.mxu0 %v4791_v19 }
 0x30a   :  { %4058 = vmatprep.subr.bf16.mxu1 %v4791_v19 }
 0x30c   :  { %947 = vrot.lane.b32.xlu1 %v5039_v23, %s4793_s12 }
 0x30f   :  { %4055 = vmatmul.mubr.msk.bf16.vlgmr.msra.gmra.mrb[12].mxu0 %vm685_vm2, %v5058_v32 }
 0x310   :  { %4065 = vmatpush3.bf16.msra.mxu0 %v849_v34  ;;  %944 = vrot.lane.b32.xlu1 %v5058_v32, %s4793_s12 }
 0x311   :  { %4049 = vmatmul.mubr.msk.bf16.vlgmr.msra.gmra.mrb[8].mxu1 %vm685_vm2, %v5060_v33  ;;  %4066 = vmatprep.mubr.msk.bf16.mxu0 %vm4792_vm1, %v4791_v19 }
 0x312   :  { %4059 = vmatpush3.bf16.msra.mxu1 %v803_v35  ;;  %4060 = vmatprep.mubr.msk.bf16.mxu1 %vm4792_vm1, %v4791_v19 }
 0x313   :  { %4070 = vmatprep.subr.bf16.mxu1 %v4791_v19  ;;  %4076 = vmatprep.subr.bf16.mxu0 %v4791_v19 }
 0x314   :  { %1016 = vrot.lane.b32.xlu1 %v5056_v31, %s4793_s12 }
 0x318   :  { %1115 = vrot.lane.b32.xlu1 %v5041_v24, %s4794_s27 }
 0x31c   :  { %1165 = vrot.lane.b32.xlu1 %v5039_v23, %s4794_s27 }
 0x37a   :  { %v896_v60 = vpop.permute.xlu1 %895 }
 0x37b   :  { %v901_v5 = vsel %vm685_vm2, %v896_v60, 0 }
 0x37e   :  { %v948_v62 = vpop.permute.xlu1 %947 }
 0x37f   :  { %v953_v9 = vsel %vm685_vm2, %v948_v62, 0 }
 0x382   :  { %v945_v4 = vpop.permute.xlu1 %944 }
 0x386   :  { %v1017_v12 = vpop.permute.xlu1 %1016 }
 0x387   :  { %v1022_v15 = vsel %vm801_vm3, %v1017_v12, 0 }
 0x3e2   :  { %v772_v39 = vpop.f32.mrb[12].mxu0 }
 0x3e3   :  { %v779_v40 = vmul.f32 2.828427, %v772_v39  ;;  %v4056_v41 = vpop.f32.mrb[13].mxu0 }
 0x3e4   :  { %v726_v42 = vpop.f32.mrb[8].mxu1  ;;  %v775_v43 = vpop.f32.mrb[14].mxu0 }
 0x3e5   :  { %v781_v44 = vadd.f32 %v779_v40, %v5085_v38  ;;  %v778_v45 = vmul.f32 2.828427, %v726_v42  ;;  %v4050_v46 = vpop.f32.mrb[9].mxu1  ;;  %v4057_v47 = vpop.f32.mrb[15].mxu0 }
 0x3e6   :  { %v729_v48 = vpop.f32.mrb[10].mxu1 }
 0x3e7   :  { %v780_v50 = vadd.f32 %v778_v45, %v5085_v38  ;;  %v4051_v51 = vpop.f32.mrb[11].mxu1  ;;  %v784_v53 = vmul.f32 1.442695, %v781_v44 }
 0x3e9   :  { %v782_v54 = vmul.f32 1.442695, %v780_v50 }
 0x3eb   :  { %4515 = vpow2.f32 %v782_v54 }
 0x3ec   :  { %4517 = vpow2.f32 %v784_v53  ;;  %v1116_v53 = vpop.permute.xlu1 %1115 }
 0x3f0   :  { %v1166_v54 = vpop.permute.xlu1 %1165 }
 0x3f5   :  { %v4516_v55 = vpop.eup %4515 }
 0x3f6   :  { %v786_v56 = vsel %vm685_vm2, %v4516_v55, 0.0  ;;  %v4518_v57 = vpop.eup %4517 }
 0x3f7   :  { %787 = vadd.xlane.f32.xlu0 %v786_v56  ;;  %v789_v58 = vsel %vm685_vm2, %v4518_v57, 0.0 }
 0x3fb   :  { %790 = vadd.xlane.f32.xlu0 %v789_v58 }
 0x411   :  { %892 = vrot.lane.b32.xlu0 %v5060_v33, %s4793_s12 }
 0x484   :  { %v788_v59 = vpop.xlane.xlu0 %787 }
 0x485   :  { %4519 = vrcp.f32 %v788_v59 }
 0x488   :  { %v791_v61 = vpop.xlane.xlu0 %790 }
 0x489   :  { %4521 = vrcp.f32 %v791_v61 }
 0x48c   :  { %v893_v13 = vpop.permute.xlu0 %892 }
 0x48f   :  { %v4520_v63 = vpop.eup %4519 }
 0x490   :  { %v794_v1 = vmul.f32 %v4520_v63, %v4516_v55 }
 0x492   :  { %v796_v2 = vpack.c.bf16 %v794_v1, %v794_v1  ;;  %v1121_v1 = vsel %vm685_vm2, %v1116_v53, 0 }
 0x493   :  { %v4522_v3 = vpop.eup %4521 }
 0x494   :  { %v795_v6 = vmul.f32 %v4522_v3, %v4518_v57  ;;  %4061 = vmatmul.mubr.msk.bf16.vlgmr.msra.gmra.mrb[12].mxu1 %vm685_vm2, %v796_v2 }
 0x495   :  { %4071 = vmatpush3.bf16.xpose.msra.mxu1 %v901_v5  ;;  %4072 = vmatprep.mubr.msk.bf16.mxu1 %vm4792_vm1, %v4791_v19  ;;  %v1171_v5 = vsel %vm685_vm2, %v1166_v54, 0 }
 0x496   :  { %v797_v7 = vpack.c.bf16 %v795_v6, %v795_v6  ;;  %4082 = vmatprep.subr.bf16.mxu1 %v4791_v19 }
 0x498   :  { %4067 = vmatmul.mubr.msk.bf16.vlgmr.msra.gmra.mrb[16].mxu0 %vm685_vm2, %v797_v7 }
 0x499   :  { %4077 = vmatpush3.bf16.xpose.msra.mxu0 %v953_v9  ;;  %4078 = vmatprep.mubr.msk.bf16.mxu0 %vm4792_vm1, %v4791_v19 }
 0x49a   :  { %4088 = vmatprep.subr.bf16.mxu0 %v4791_v19 }
 0x49c   :  { %4073 = vmatmul.mubr.msk.bf16.vlgmr.msra.gmra.mrb[16].mxu1 %vm685_vm2, %v893_v13 }
 0x49d   :  { %4083 = vmatpush3.bf16.msra.mxu1 %v1022_v15  ;;  %4084 = vmatprep.mubr.msk.bf16.mxu1 %vm4792_vm1, %v4791_v19 }
 0x49e   :  { %4094 = vmatprep.subr.bf16.mxu1 %v4791_v19 }
 0x4a0   :  { %4079 = vmatmul.mubr.msk.bf16.vlgmr.msra.gmra.mrb[20].mxu0 %vm685_vm2, %v945_v4 }
 0x4a1   :  { %4090 = vmatprep.mubr.msk.bf16.mxu0 %vm4792_vm1, %v4791_v19 }
 0x567   :  { %v5111_v16 = vpop.f32.mrb[12].mxu1 }
 0x568   :  { %v4062_v18 = vpop.f32.mrb[13].mxu1 }
 0x569   :  { %v842_v20 = vpop.f32.mrb[14].mxu1 }
 0x56a   :  { %v4063_v21 = vpop.f32.mrb[15].mxu1 }
 0x56b   :  { %v5113_v22 = vpop.f32.mrb[16].mxu0 }
 0x56c   :  { %v4068_v25 = vpop.f32.mrb[17].mxu0 }
 0x56d   :  { %v888_v26 = vpop.f32.mrb[18].mxu0 }
 0x56e   :  { %v4069_v27 = vpop.f32.mrb[19].mxu0 }
 0x56f   :  { %v937_v28 = vpop.f32.mrb[16].mxu1 }
 0x570   :  { %v995_v30 = vmul.f32 2.828427, %v937_v28  ;;  %v4074_v34 = vpop.f32.mrb[17].mxu1 }
 0x571   :  { %v940_v35 = vpop.f32.mrb[18].mxu1 }
 0x572   :  { %v997_v36 = vadd.f32 %v995_v30, %v5085_v38  ;;  %v4075_v37 = vpop.f32.mrb[19].mxu1 }
 0x573   :  { %v989_v39 = vpop.f32.mrb[20].mxu0 }
 0x574   :  { %v999_v40 = vmul.f32 1.442695, %v997_v36  ;;  %v996_v41 = vmul.f32 2.828427, %v989_v39  ;;  %v4080_v42 = vpop.f32.mrb[21].mxu0 }
 0x575   :  { %v992_v43 = vpop.f32.mrb[22].mxu0 }
 0x576   :  { %4523 = vpow2.f32 %v999_v40  ;;  %v998_v44 = vadd.f32 %v996_v41, %v5085_v38  ;;  %v4081_v45 = vpop.f32.mrb[23].mxu0 }
 0x578   :  { %v1001_v46 = vmul.f32 1.442695, %v998_v44 }
 0x57a   :  { %4525 = vpow2.f32 %v1001_v46 }
 0x580   :  { %v4524_v47 = vpop.eup %4523 }
 0x581   :  { %v1003_v48 = vsel %vm685_vm2, %v4524_v47, 0.0 }
 0x582   :  { %1004 = vadd.xlane.f32.xlu1 %v1003_v48 }
 0x584   :  { %v4526_v50 = vpop.eup %4525 }
 0x585   :  { %v1006_v51 = vsel %vm685_vm2, %v4526_v50, 0.0 }
 0x586   :  { %1007 = vadd.xlane.f32.xlu0 %v1006_v51 }
 0x593   :  { %1113 = vrot.lane.b32.xlu1 %v5060_v33, %s4794_s27 }
 0x597   :  { %1163 = vrot.lane.b32.xlu1 %v5058_v32, %s4794_s27 }
 0x59b   :  { %1281 = vrot.lane.b32.xlu1 %v5052_v29, %s4794_s27 }
 0x59c   :  { %1065 = vrot.lane.b32.xlu0 %v5052_v29, %s4793_s12 }
 0x5a0   :  { %1233 = vrot.lane.b32.xlu0 %v5056_v31, %s4794_s27 }
 0x60f   :  { %v1005_v55 = vpop.xlane.xlu1 %1004 }
 0x610   :  { %4527 = vrcp.f32 %v1005_v55 }
 0x613   :  { %v1008_v56 = vpop.xlane.xlu0 %1007  ;;  %v1114_v61 = vpop.permute.xlu1 %1113 }
 0x614   :  { %4529 = vrcp.f32 %v1008_v56 }
 0x617   :  { %v1066_v57 = vpop.permute.xlu0 %1065  ;;  %v1164_v4 = vpop.permute.xlu1 %1163 }
 0x618   :  { %v1071_v58 = vsel %vm801_vm3, %v1066_v57, 0 }
 0x619   :  { %4089 = vmatpush3.bf16.msra.mxu0 %v1071_v58 }
 0x61a   :  { %v4528_v59 = vpop.eup %4527  ;;  %4100 = vmatprep.subr.bf16.mxu0 %v4791_v19 }
 0x61b   :  { %v1011_v60 = vmul.f32 %v4528_v59, %v4524_v47  ;;  %v1234_v6 = vpop.permute.xlu0 %1233  ;;  %v1282_v9 = vpop.permute.xlu1 %1281 }
 0x61c   :  { %v1239_v7 = vsel %vm801_vm3, %v1234_v6, 0  ;;  %v1287_v12 = vsel %vm801_vm3, %v1282_v9, 0 }
 0x61d   :  { %v1013_v62 = vpack.c.bf16 %v1011_v60, %v1011_v60 }
 0x61e   :  { %v4530_v63 = vpop.eup %4529 }
 0x61f   :  { %v1012_v2 = vmul.f32 %v4530_v63, %v4526_v50  ;;  %4085 = vmatmul.mubr.msk.bf16.vlgmr.msra.gmra.mrb[20].mxu1 %vm685_vm2, %v1013_v62 }
 0x620   :  { %4095 = vmatpush3.bf16.xpose.msra.mxu1 %v1121_v1  ;;  %4096 = vmatprep.mubr.msk.bf16.mxu1 %vm4792_vm1, %v4791_v19 }
 0x621   :  { %v1014_v3 = vpack.c.bf16 %v1012_v2, %v1012_v2  ;;  %4106 = vmatprep.subr.bf16.mxu1 %v4791_v19 }
 0x623   :  { %4091 = vmatmul.mubr.msk.bf16.vlgmr.msra.gmra.mrb[24].mxu0 %vm685_vm2, %v1014_v3 }
 0x624   :  { %4101 = vmatpush3.bf16.xpose.msra.mxu0 %v1171_v5  ;;  %4102 = vmatprep.mubr.msk.bf16.mxu0 %vm4792_vm1, %v4791_v19 }
 0x625   :  { %4112 = vmatprep.subr.bf16.mxu0 %v4791_v19 }
 0x627   :  { %4097 = vmatmul.mubr.msk.bf16.vlgmr.msra.gmra.mrb[24].mxu1 %vm685_vm2, %v1114_v61 }
 0x628   :  { %4107 = vmatpush3.bf16.msra.mxu1 %v1239_v7  ;;  %4108 = vmatprep.mubr.msk.bf16.mxu1 %vm4792_vm1, %v4791_v19 }
 0x629   :  { %4118 = vmatprep.subr.bf16.mxu1 %v4791_v19 }
 0x62b   :  { %4103 = vmatmul.mubr.msk.bf16.vlgmr.msra.gmra.mrb[28].mxu0 %vm685_vm2, %v1164_v4 }
 0x62c   :  { %4113 = vmatpush3.bf16.msra.mxu0 %v1287_v12  ;;  %4114 = vmatprep.mubr.msk.bf16.mxu0 %vm4792_vm1, %v4791_v19 }
 0x62d   :  { %4124 = vmatprep.subr.bf16.mxu0 %v4791_v19 }
 0x6f2   :  { %v5151_v13 = vpop.f32.mrb[20].mxu1 }
 0x6f3   :  { %v4086_v15 = vpop.f32.mrb[21].mxu1 }
 0x6f4   :  { %v1061_v18 = vpop.f32.mrb[22].mxu1 }
 0x6f5   :  { %v4087_v20 = vpop.f32.mrb[23].mxu1 }
 0x6f6   :  { %v5153_v21 = vpop.f32.mrb[24].mxu0 }
 0x6f7   :  { %v4423_v25 = vpack.i.bf16 %v5153_v21, %v5151_v13  ;;  %v4092_v26 = vpop.f32.mrb[25].mxu0 }
 0x6f8   :  { %v1110_v27 = vpop.f32.mrb[26].mxu0 }
 0x6f9   :  { %v4093_v28 = vpop.f32.mrb[27].mxu0 }
 0x6fa   :  { %v1157_v30 = vpop.f32.mrb[24].mxu1 }
 0x6fb   :  { %v1213_v34 = vmul.f32 2.828427, %v1157_v30  ;;  %v4098_v35 = vpop.f32.mrb[25].mxu1 }
 0x6fc   :  { %v1160_v36 = vpop.f32.mrb[26].mxu1 }
 0x6fd   :  { %v1215_v37 = vadd.f32 %v1213_v34, %v5085_v38  ;;  %v4099_v39 = vpop.f32.mrb[27].mxu1 }
 0x6fe   :  { %v1207_v40 = vpop.f32.mrb[28].mxu0 }
 0x6ff   :  { %v1217_v41 = vmul.f32 1.442695, %v1215_v37  ;;  %v1214_v42 = vmul.f32 2.828427, %v1207_v40  ;;  %v4104_v43 = vpop.f32.mrb[29].mxu0 }
 0x700   :  { %v1210_v44 = vpop.f32.mrb[30].mxu0 }
 0x701   :  { %4531 = vpow2.f32 %v1217_v41  ;;  %v1216_v45 = vadd.f32 %v1214_v42, %v5085_v38  ;;  %v4105_v46 = vpop.f32.mrb[31].mxu0 }
 0x703   :  { %v1219_v47 = vmul.f32 1.442695, %v1216_v45 }
 0x705   :  { %4533 = vpow2.f32 %v1219_v47 }
 0x70b   :  { %v4532_v48 = vpop.eup %4531 }
 0x70c   :  { %v1221_v50 = vsel %vm685_vm2, %v4532_v48, 0.0 }
 0x70d   :  { %1222 = vadd.xlane.f32.xlu1 %v1221_v50 }
 0x70f   :  { %v4534_v51 = vpop.eup %4533 }
 0x710   :  { %v1224_v53 = vsel %vm685_vm2, %v4534_v51, 0.0 }
 0x711   :  { %1225 = vadd.xlane.f32.xlu0 %v1224_v53 }
 0x71e   :  { %1331 = vrot.lane.b32.xlu1 %v5041_v24, %s4796_s28 }
 0x722   :  { %1329 = vrot.lane.b32.xlu1 %v5060_v33, %s4796_s28 }
 0x727   :  { %1381 = vrot.lane.b32.xlu0 %v5039_v23, %s4796_s28 }
 0x72b   :  { %1379 = vrot.lane.b32.xlu0 %v5058_v32, %s4796_s28 }
 0x79a   :  { %v1223_v54 = vpop.xlane.xlu1 %1222 }
 0x79b   :  { %4535 = vrcp.f32 %v1223_v54 }
 0x79e   :  { %v1226_v55 = vpop.xlane.xlu0 %1225  ;;  %v1332_v58 = vpop.permute.xlu1 %1331 }
 0x79f   :  { %4537 = vrcp.f32 %v1226_v55  ;;  %v1337_v24 = vsel %vm685_vm2, %v1332_v58, 0  ;;  %v4467_v55 = vld [vmem:[%s5601_s4] sm:$0xff]  }
 0x7a2   :  { %v1382_v33 = vpop.permute.xlu0 %1381  ;;  %v1330_v62 = vpop.permute.xlu1 %1329 }
 0x7a3   :  { %v1387_v32 = vsel %vm685_vm2, %v1382_v33, 0 }
 0x7a5   :  { %v4536_v56 = vpop.eup %4535 }
 0x7a6   :  { %v1229_v57 = vmul.f32 %v4536_v56, %v4532_v48  ;;  %v1380_v63 = vpop.permute.xlu0 %1379  ;;  %v4468_v56 = vld [vmem:[%s5601_s4 + $0x8] sm:$0xff]  }
 0x7a8   :  { %v1231_v59 = vpack.c.bf16 %v1229_v57, %v1229_v57 }
 0x7a9   :  { %v4538_v60 = vpop.eup %4537 }
 0x7aa   :  { %v1230_v61 = vmul.f32 %v4538_v60, %v4534_v51  ;;  %4109 = vmatmul.mubr.msk.bf16.vlgmr.msra.gmra.mrb[28].mxu1 %vm685_vm2, %v1231_v59 }
 0x7ab   :  { %4119 = vmatpush3.bf16.xpose.msra.mxu1 %v1337_v24  ;;  %4120 = vmatprep.mubr.msk.bf16.mxu1 %vm4792_vm1, %v4791_v19 }
 0x7ac   :  { %v1232_v23 = vpack.c.bf16 %v1230_v61, %v1230_v61  ;;  %4130 = vmatprep.subr.bf16.mxu1 %v4791_v19 }
 0x7ae   :  { %4115 = vmatmul.mubr.msk.bf16.vlgmr.msra.gmra.mrb[32].mxu0 %vm685_vm2, %v1232_v23 }
 0x7af   :  { %4125 = vmatpush3.bf16.xpose.msra.mxu0 %v1387_v32  ;;  %4126 = vmatprep.mubr.msk.bf16.mxu0 %vm4792_vm1, %v4791_v19 }
 0x7b0   :  { %4136 = vmatprep.subr.bf16.mxu0 %v4791_v19 }
 0x7b2   :  { %4121 = vmatmul.mubr.msk.bf16.vlgmr.msra.gmra.mrb[32].mxu1 %vm685_vm2, %v1330_v62 }
 0x7b3   :  { %4132 = vmatprep.mubr.msk.bf16.mxu1 %vm4792_vm1, %v4791_v19 }
 0x7b6   :  { %4127 = vmatmul.mubr.msk.bf16.vlgmr.msra.gmra.mrb[36].mxu0 %vm685_vm2, %v1380_v63 }
 0x7b7   :  { %4138 = vmatprep.mubr.msk.bf16.mxu0 %vm4792_vm1, %v4791_v19 }
 0x87d   :  { %v1275_v1 = vpop.f32.mrb[28].mxu1 }
 0x87e   :  { %v4110_v2 = vpop.f32.mrb[29].mxu1 }
 0x87f   :  { %v1278_v3 = vpop.f32.mrb[30].mxu1 }
 0x880   :  { %v4111_v4 = vpop.f32.mrb[31].mxu1 }
 0x881   :  { %v1323_v5 = vpop.f32.mrb[32].mxu0 }
 0x882   :  { %v4428_v6 = vpack.i.bf16 %v1323_v5, %v1275_v1  ;;  %v4116_v7 = vpop.f32.mrb[33].mxu0 }
 0x883   :  { %v1326_v9 = vpop.f32.mrb[34].mxu0 }
 0x884   :  { %v4117_v12 = vpop.f32.mrb[35].mxu0 }
 0x885   :  { %v1373_v15 = vpop.f32.mrb[32].mxu1 }
 0x886   :  { %v1429_v18 = vmul.f32 2.828427, %v1373_v15  ;;  %v4122_v20 = vpop.f32.mrb[33].mxu1 }
 0x887   :  { %v1376_v26 = vpop.f32.mrb[34].mxu1 }
 0x888   :  { %v1431_v27 = vadd.f32 %v1429_v18, %v5085_v38  ;;  %v4123_v28 = vpop.f32.mrb[35].mxu1 }
 0x889   :  { %v1423_v30 = vpop.f32.mrb[36].mxu0 }
 0x88a   :  { %v1433_v34 = vmul.f32 1.442695, %v1431_v27  ;;  %v1430_v35 = vmul.f32 2.828427, %v1423_v30  ;;  %v4128_v36 = vpop.f32.mrb[37].mxu0 }
 0x88b   :  { %v1426_v37 = vpop.f32.mrb[38].mxu0 }
 0x88c   :  { %4539 = vpow2.f32 %v1433_v34  ;;  %v1432_v39 = vadd.f32 %v1430_v35, %v5085_v38  ;;  %v4129_v40 = vpop.f32.mrb[39].mxu0 }
 0x88e   :  { %v1435_v41 = vmul.f32 1.442695, %v1432_v39 }
 0x890   :  { %4541 = vpow2.f32 %v1435_v41 }
 0x896   :  { %v4540_v42 = vpop.eup %4539 }
 0x897   :  { %v1437_v43 = vsel %vm685_vm2, %v4540_v42, 0.0 }
 0x898   :  { %1438 = vadd.xlane.f32.xlu1 %v1437_v43  ;;  %v1656_v43 = vsub.s32 1, %v5025_v8 }
 0x89a   :  { %v4542_v44 = vpop.eup %4541 }
 0x89b   :  { %v1440_v45 = vsel %vm685_vm2, %v4542_v44, 0.0 }
 0x89c   :  { %1441 = vadd.xlane.f32.xlu0 %v1440_v45 }
 0x8a9   :  { %1497 = vrot.lane.b32.xlu1 %v5052_v29, %s4796_s28 }
 0x8ad   :  { %4424 = vrot.lane.b32.xlu1 %v4423_v25, %s4782_s22 }
 0x8b2   :  { %1449 = vrot.lane.b32.xlu0 %v5056_v31, %s4796_s28 }
 0x8b6   :  { %4429 = vrot.lane.b32.xlu0 %v4428_v6, %s4797_s3 }
 0x925   :  { %v1439_v46 = vpop.xlane.xlu1 %1438 }
 0x926   :  { %4543 = vrcp.f32 %v1439_v46  ;;  %v1657_v46 = vrot.slane %v5031_v11, %v1656_v43 }
 0x929   :  { %v1442_v47 = vpop.xlane.xlu0 %1441  ;;  %v1498_v48 = vpop.permute.xlu1 %1497 }
 0x92a   :  { %4545 = vrcp.f32 %v1442_v47  ;;  %v1503_v50 = vsel %vm801_vm3, %v1498_v48, 0  ;;  %v4635_v48 = vld [vmem:[#allocation2] sm:$0xff] }
 0x92b   :  { %4137 = vmatpush3.bf16.msra.mxu0 %v1503_v50 }
 0x92d   :  { %v1450_v29 = vpop.permute.xlu0 %1449  ;;  %v4425_v62 = vpop.permute.xlu1 %4424 }
 0x92e   :  { %v1455_v51 = vsel %vm801_vm3, %v1450_v29, 0  ;;  %v4427_v1 = vunpack.i.h.bf16 %v4425_v62  ;;  %v4426_v2 = vunpack.i.l.bf16 %v4425_v62 }
 0x92f   :  { %4131 = vmatpush3.bf16.msra.mxu1 %v1455_v51 }
 0x930   :  { %v4544_v13 = vpop.eup %4543  ;;  %4142 = vmatprep.subr.bf16.mxu1 %v4791_v19  ;;  %v1570_v6 = vsel %vm685_vm2, %v5113_v22, %v4427_v1  ;;  %v1569_v7 = vsel %vm685_vm2, %v5111_v16, %v4426_v2 }
 0x931   :  { %v1445_v21 = vmul.f32 %v4544_v13, %v4540_v42  ;;  %v4430_v63 = vpop.permute.xlu0 %4429  ;;  %v4636_v13 = vld [vmem:[#allocation2 + $0x8] sm:$0xff] }
 0x932   :  { %v4432_v3 = vunpack.i.h.bf16 %v4430_v63  ;;  %v4431_v4 = vunpack.i.l.bf16 %v4430_v63 }
 0x933   :  { %v1447_v31 = vpack.c.bf16 %v1445_v21, %v1445_v21 }
 0x934   :  { %v4546_v25 = vpop.eup %4545  ;;  %v1572_v15 = vsel %vm1571_vm5, %v1569_v7, %v4431_v4  ;;  %v1573_v18 = vsel %vm1571_vm5, %v1570_v6, %v4432_v3  ;;  %v4475_v4 = vld [vmem:[%s5603_s6] sm:$0xff]   ;;  %v4477_v6 = vld [vmem:[%s5603_s6 + $0x10] sm:$0xff]   ;;  %v4478_v7 = vld [vmem:[%s5603_s6 + $0x18] sm:$0xff]  }
 0x935   :  { %v1446_v53 = vmul.f32 %v4546_v25, %v4542_v44  ;;  %4133 = vmatmul.mubr.msk.bf16.vlgmr.msra.gmra.mrb[36].mxu1 %vm685_vm2, %v1447_v31 }
 0x936   :  { %4146 = vmatprep.mubr.msk.bf16.mxu1 %vm4792_vm1, %v4791_v19  ;;  %4143 = vmatpush3.bf16.msra.mxu1 %v4467_v55 }
 0x937   :  { %v1448_v54 = vpack.c.bf16 %v1446_v53, %v1446_v53  ;;  %4144 = vmatprep.subr.bf16.mxu1 %v4791_v19 }
 0x939   :  { %4139 = vmatmul.mubr.msk.bf16.vlgmr.msra.gmra.mrb[40].mxu0 %vm685_vm2, %v1448_v54 }
 0x93a   :  { %1736 = vmatprep.mubr.bf16.mxu0 %v4790_v0  ;;  %4145 = vmatpush3.bf16.msra.mxu1 %v4468_v56 }
 0x93b   :  { %4150 = vmatprep.subr.bf16.mxu1 %v4791_v19 }
 0xa08   :  { %v1491_v57 = vpop.f32.mrb[36].mxu1 }
 0xa09   :  { %v4134_v58 = vpop.f32.mrb[37].mxu1 }
 0xa0a   :  { %v1494_v59 = vpop.f32.mrb[38].mxu1  ;;  %v4471_v58 = vld [vmem:[#allocation8 + $0x4] ss:$8 sps:$4 sm:$0xff]  }
 0xa0b   :  { %v4135_v60 = vpop.f32.mrb[39].mxu1  ;;  %v4469_v59 = vld [vmem:[#allocation8] ss:$8 sps:$4 sm:$0xff]   ;;  %1704 = vmatprep.subr.bf16.mxu0 %v4471_v58 }
 0xa0c   :  { %v1539_v61 = vpop.f32.mrb[40].mxu0  ;;  %1705 = vmatpush1.bf16.msra.mxu0 %v4469_v59  ;;  %v4474_v60 = vld [vmem:[#allocation8 + $0x14] ss:$8 sps:$4 sm:$0xff]  }
 0xa0d   :  { %v4433_v24 = vpack.i.bf16 %v1539_v61, %v1491_v57  ;;  %v4140_v33 = vpop.f32.mrb[41].mxu0  ;;  %v4472_v61 = vld [vmem:[#allocation8 + $0x10] ss:$8 sps:$4 sm:$0xff]   ;;  %1706 = vmatprep.subr.bf16.mxu0 %v4474_v60 }
 0xa0e   :  { %v1542_v23 = vpop.f32.mrb[42].mxu0 }
 0xa0f   :  { %v4141_v32 = vpop.f32.mrb[43].mxu0  ;;  %4434 = vrot.lane.b32.xlu1 %v4433_v24, %s4798_s11 }
 0xa10   :  { %1707 = vmatpush1.bf16.msra.mxu0 %v4472_v61  ;;  %v1869_v61 = vsub.s32 2, %v5025_v8 }
 0xa81   :  { %v4435_v5 = vpop.permute.xlu1 %4434 }
 0xa82   :  { %v4437_v9 = vunpack.i.h.bf16 %v4435_v5  ;;  %v4436_v12 = vunpack.i.l.bf16 %v4435_v5  ;;  %v4476_v5 = vld [vmem:[%s5603_s6 + $0x8] sm:$0xff]  }
 0xa84   :  { %v1576_v20 = vsel %vm1574_vm6, %v1573_v18, %v4437_v9  ;;  %v1575_v26 = vsel %vm1574_vm6, %v1572_v15, %v4436_v12  ;;  %v1755_v9 = vsub.s32 4, %v5025_v8 }
 0xa85   :  { %v1577_v27 = vpack.c.bf16 %v1576_v20, %v1575_v26 }
 0xa86   :  { %v1756_v12 = vrot.slane %v5031_v11, %v1755_v9 }
 0xa87   :  { %4147 = vmatmul.mubr.msk.bf16.vlgmr.msra.gmra.mrb[40].mxu1 %vm188_vm0, %v1577_v27 }
 0xa88   :  { %4158 = vmatprep.mubr.msk.bf16.mxu1 %vm4792_vm1, %v4791_v19  ;;  %4151 = vmatpush3.bf16.msra.mxu1 %v4475_v4 }
 0xa89   :  { %4152 = vmatprep.subr.bf16.mxu1 %v4791_v19 }
 0xa8c   :  { %4153 = vmatpush3.bf16.msra.mxu1 %v4476_v5 }
 0xa8d   :  { %4154 = vmatprep.subr.bf16.mxu1 %v4791_v19 }
 0xa90   :  { %4155 = vmatpush3.bf16.msra.mxu1 %v4477_v6 }
 0xa91   :  { %4156 = vmatprep.subr.bf16.mxu1 %v4791_v19 }
 0xa94   :  { %4157 = vmatpush3.bf16.msra.mxu1 %v4478_v7 }
 0xa95   :  { %4162 = vmatprep.subr.bf16.mxu1 %v4791_v19 }
 0xb5a   :  { %v1631_v22 = vpop.f32.mrb[40].mxu1 }
 0xb5b   :  { %v1638_v28 = vmul.f32 %v1631_v22, %v1631_v22  ;;  %v4148_v30 = vpop.f32.mrb[41].mxu1 }
 0xb5c   :  { %v1634_v16 = vpop.f32.mrb[42].mxu1 }
 0xb5d   :  { %v1639_v34 = vmul.f32 %v1634_v16, %v1634_v16  ;;  %v4149_v35 = vpop.f32.mrb[43].mxu1  ;;  %v1640_v36 = vsel %vm188_vm0, %v1638_v28, 0.0 }
 0xb5e   :  { %1641 = vadd.xlane.f32.xlu0 %v1640_v36 }
 0xb5f   :  { %v1643_v37 = vsel %vm188_vm0, %v1639_v34, 0.0 }
 0xb60   :  { %1644 = vadd.xlane.f32.xlu1 %v1643_v37 }
 0xbeb   :  { %v1642_v39 = vpop.xlane.xlu0 %1641 }
 0xbec   :  { %v1646_v40 = vmax.f32 %v1642_v39, 1e-12 }
 0xbed   :  { %v1645_v41 = vpop.xlane.xlu1 %1644 }
 0xbee   :  { %4547 = vrsqrt.f32 %v1646_v40  ;;  %v1647_v42 = vmax.f32 %v1645_v41, 1e-12  ;;  %v1749_v40 = vsub.s32 3, %v5025_v8 }
 0xbf0   :  { %4549 = vrsqrt.f32 %v1647_v42  ;;  %v1750_v41 = vrot.slane %v5031_v11, %v1749_v40 }
 0xbf8   :  { %v4548_v44 = vpop.eup %4547 }
 0xbf9   :  { %v1650_v45 = vmul.f32 %v4548_v44, %v1631_v22 }
 0xbfa   :  { %v4550_v47 = vpop.eup %4549 }
 0xbfb   :  { %v1652_v50 = vsub.f32 %v1650_v45, %v4635_v48  ;;  %v1651_v29 = vmul.f32 %v4550_v47, %v1634_v16 }
 0xbfd   :  { %v1658_v51 = vmul.f32 %v1657_v46, %v1652_v50  ;;  %v1653_v21 = vsub.f32 %v1651_v29, %v4636_v13 }
 0xbff   :  { %v1660_v31 = vadd.f32 %v4635_v48, %v1658_v51  ;;  %v1659_v25 = vmul.f32 %v1657_v46, %v1653_v21 }
 0xc01   :  { %v1662_v53 = vmul.f32 %v1660_v31, %v1660_v31  ;;  %v1661_v54 = vadd.f32 %v4636_v13, %v1659_v25 }
 0xc03   :  { %v1664_v55 = vsel %vm188_vm0, %v1662_v53, 0.0  ;;  %v1663_v56 = vmul.f32 %v1661_v54, %v1661_v54 }
 0xc04   :  { %1665 = vadd.xlane.f32.xlu0 %v1664_v55 }
 0xc05   :  { %v1667_v57 = vsel %vm188_vm0, %v1663_v56, 0.0 }
 0xc08   :  { %1668 = vadd.xlane.f32.xlu0 %v1667_v57 }
 0xc91   :  { %v1666_v24 = vpop.xlane.xlu0 %1665 }
 0xc92   :  { %v1670_v33 = vmax.f32 %v1666_v24, 1e-12 }
 0xc94   :  { %4551 = vrsqrt.f32 %v1670_v33 }
 0xc95   :  { %v1669_v23 = vpop.xlane.xlu0 %1668 }
 0xc96   :  { %v1671_v32 = vmax.f32 %v1669_v23, 1e-12  ;;  %v1870_v23 = vrot.slane %v5031_v11, %v1869_v61  ;;  %v4481_v11 = vld [vmem:[#allocation7 + $0x54] ss:$20 sps:$4 sm:$0xff]  }
 0xc97   :  { %1960 = vmatprep.subr.bf16.mxu0 %v4481_v11 }
 0xc98   :  { %4553 = vrsqrt.f32 %v1671_v32 }
 0xc9e   :  { %v4552_v62 = vpop.eup %4551 }
 0xc9f   :  { %v5234_v1 = vmul.f32 %v4552_v62, %v1660_v31 }
 0xca2   :  { %v4554_v63 = vpop.eup %4553 }
 0xca3   :  { %v5236_v2 = vmul.f32 %v4554_v63, %v1661_v54 }
 0xca5   :  { %v1676_v3 = vpack.c.bf16 %v5236_v2, %v5234_v1 }
 0xca7   :  { %3785 = vmatmul.mubr.msk.bf16.vlgmr.msra.gmra.mrb[44].mxu0 %vm188_vm0, %v1676_v3 }
 0xca8   :  { %1992 = vmatprep.mubr.bf16.mxu0 %v4790_v0 }
 0xd7a   :  { %v1738_v15 = vpop.f32.mrb[44].mxu0 }
 0xd7b   :  { %v1740_v18 = vpop.f32.mrb[45].mxu0  ;;  %v1751_v44 = vmul.f32 %v1750_v41, %v1738_v15 }
 0xd7c   :  { %v1757_v20 = vmul.f32 %v1756_v12, %v1740_v18  ;;  %v1742_v26 = vpop.f32.mrb[46].mxu0 }
 0xd7d   :  { %v1744_v27 = vpop.f32.mrb[47].mxu0  ;;  %v1752_v48 = vmul.f32 %v1750_v41, %v1742_v26  ;;  %v4479_v26 = vld [vmem:[#allocation7 + $0x50] ss:$20 sps:$4 sm:$0xff]  }
 0xd7e   :  { %v1759_v22 = vsub.f32 0.0, %v1757_v20  ;;  %v1758_v28 = vmul.f32 %v1756_v12, %v1744_v27  ;;  %v4482_v27 = vld [vmem:[#allocation7 + $0x60] ss:$20 sps:$4 sm:$0xff]   ;;  %1961 = vmatpush1.bf16.msra.mxu0 %v4479_v26 }
 0xd80   :  { %v1761_v30 = vmul.f32 1.442695, %v1759_v22  ;;  %v1760_v16 = vsub.f32 0.0, %v1758_v28  ;;  %v4485_v22 = vld [vmem:[#allocation7 + $0x7c] ss:$20 sps:$4 sm:$0xff]  }
 0xd81   :  { %1962 = vmatprep.subr.bf16.mxu0 %v4485_v22 }
 0xd82   :  { %4555 = vpow2.f32 %v1761_v30  ;;  %v1763_v34 = vmul.f32 1.442695, %v1760_v16 }
 0xd84   :  { %4557 = vpow2.f32 %v1763_v34 }
 0xd8c   :  { %v4556_v35 = vpop.eup %4555 }
 0xd8d   :  { %v1765_v36 = vadd.f32 1.0, %v4556_v35 }
 0xd8e   :  { %v4558_v37 = vpop.eup %4557 }
 0xd8f   :  { %4559 = vrcp.f32 %v1765_v36  ;;  %v1766_v39 = vadd.f32 1.0, %v4558_v37 }
 0xd91   :  { %4561 = vrcp.f32 %v1766_v39 }
 0xd99   :  { %v4560_v42 = vpop.eup %4559 }
 0xd9a   :  { %v1769_v45 = vmul.f32 %v4560_v42, %v1757_v20  ;;  %v4487_v42 = vld [vmem:[#allocation7 + $0x58] ss:$20 sps:$4 sm:$0xff]  }
 0xd9b   :  { %v4562_v46 = vpop.eup %4561 }
 0xd9c   :  { %v1771_v47 = vmul.f32 %v1769_v45, %v1751_v44  ;;  %v1770_v50 = vmul.f32 %v4562_v46, %v1758_v28  ;;  %v4486_v28 = vld [vmem:[#allocation7 + $0x88] ss:$20 sps:$4 sm:$0xff]   ;;  %v4492_v45 = vld [vmem:[#allocation7 + $0x84] ss:$20 sps:$4 sm:$0xff]   ;;  %v4490_v46 = vld [vmem:[#allocation7 + $0x80] ss:$20 sps:$4 sm:$0xff]  }
 0xd9e   :  { %v1772_v29 = vmul.f32 %v1770_v50, %v1752_v48  ;;  %v4637_v50 = vld [vmem:[#allocation5 + $0x8] sm:$0xff] }
 0xda0   :  { %v1773_v51 = vpack.c.bf16 %v1772_v29, %v1771_v47 }
 0xda2   :  { %4159 = vmatmul.mubr.msk.bf16.vlgmr.msra.gmra.mrb[44].mxu1 %vm1806_vm7, %v1773_v51 }
 0xda3   :  { %4166 = vmatprep.mubr.msk.bf16.mxu1 %vm4792_vm1, %v4791_v19  ;;  %4163 = vmatpush3.bf16.msra.mxu1 %v4482_v27 }
 0xda4   :  { %4164 = vmatprep.subr.bf16.mxu1 %v4791_v19 }
 0xda7   :  { %4165 = vmatpush3.bf16.msra.mxu1 %v4486_v28 }
 0xda8   :  { %4379 = vmatprep.subr.bf16.mxu1 %v4996_v49 }
 0xe75   :  { %v1844_v13 = vpop.f32.mrb[44].mxu1 }
 0xe76   :  { %v1851_v21 = vmul.f32 %v1844_v13, %v1844_v13  ;;  %v4160_v31 = vpop.f32.mrb[45].mxu1 }
 0xe77   :  { %v1847_v25 = vpop.f32.mrb[46].mxu1 }
 0xe78   :  { %v1852_v53 = vmul.f32 %v1847_v25, %v1847_v25  ;;  %v4161_v54 = vpop.f32.mrb[47].mxu1  ;;  %v1853_v55 = vsel %vm188_vm0, %v1851_v21, 0.0  ;;  %v4638_v21 = vld [vmem:[#allocation5] sm:$0xff] }
 0xe79   :  { %1854 = vadd.xlane.f32.xlu1 %v1853_v55 }
 0xe7a   :  { %v1856_v56 = vsel %vm188_vm0, %v1852_v53, 0.0 }
 0xe7b   :  { %1857 = vadd.xlane.f32.xlu0 %v1856_v56 }
 0xf06   :  { %v1855_v57 = vpop.xlane.xlu1 %1854 }
 0xf07   :  { %v1859_v58 = vmax.f32 %v1855_v57, 1e-12 }
 0xf08   :  { %v1858_v59 = vpop.xlane.xlu0 %1857 }
 0xf09   :  { %4563 = vrsqrt.f32 %v1859_v58  ;;  %v1860_v60 = vmax.f32 %v1858_v59, 1e-12 }
 0xf0b   :  { %4565 = vrsqrt.f32 %v1860_v60 }
 0xf13   :  { %v4564_v24 = vpop.eup %4563 }
 0xf14   :  { %v1863_v33 = vmul.f32 %v4564_v24, %v1844_v13 }
 0xf15   :  { %v4566_v32 = vpop.eup %4565 }
 0xf16   :  { %v1865_v62 = vsub.f32 %v1863_v33, %v5234_v1  ;;  %v1864_v63 = vmul.f32 %v4566_v32, %v1847_v25 }
 0xf18   :  { %v1871_v3 = vmul.f32 %v1870_v23, %v1865_v62  ;;  %v1866_v4 = vsub.f32 %v1864_v63, %v5236_v2 }
 0xf1a   :  { %v1873_v5 = vadd.f32 %v1871_v3, %v5234_v1  ;;  %v1872_v6 = vmul.f32 %v1870_v23, %v1866_v4  ;;  %v4483_v1 = vld [vmem:[#allocation7 + $0x78] ss:$20 sps:$4 sm:$0xff]  }
 0xf1b   :  { %1963 = vmatpush1.bf16.msra.mxu0 %v4483_v1 }
 0xf1c   :  { %v1875_v7 = vmul.f32 %v1873_v5, %v1873_v5  ;;  %v1874_v12 = vadd.f32 %v1872_v6, %v5236_v2  ;;  %v4489_v2 = vld [vmem:[#allocation7 + $0x5c] ss:$20 sps:$4 sm:$0xff]  }
 0xf1d   :  { %2003 = vmatprep.subr.bf16.mxu0 %v4489_v2 }
 0xf1e   :  { %v1877_v15 = vsel %vm188_vm0, %v1875_v7, 0.0  ;;  %v1876_v18 = vmul.f32 %v1874_v12, %v1874_v12 }
 0xf1f   :  { %1878 = vadd.xlane.f32.xlu1 %v1877_v15 }
 0xf20   :  { %v1880_v20 = vsel %vm188_vm0, %v1876_v18, 0.0 }
 0xf21   :  { %1881 = vadd.xlane.f32.xlu0 %v1880_v20 }
 0xfac   :  { %v1879_v30 = vpop.xlane.xlu1 %1878 }
 0xfad   :  { %v1883_v16 = vmax.f32 %v1879_v30, 1e-12 }
 0xfae   :  { %v1882_v34 = vpop.xlane.xlu0 %1881 }
 0xfaf   :  { %4567 = vrsqrt.f32 %v1883_v16  ;;  %v1884_v35 = vmax.f32 %v1882_v34, 1e-12 }
 0xfb1   :  { %4569 = vrsqrt.f32 %v1884_v35 }
 0xfb9   :  { %v4568_v36 = vpop.eup %4567 }
 0xfba   :  { %v5283_v39 = vmul.f32 %v4568_v36, %v1873_v5 }
 0xfbb   :  { %v4570_v37 = vpop.eup %4569 }
 0xfbc   :  { %v5285_v41 = vmul.f32 %v4570_v37, %v1874_v12 }
 0xfbe   :  { %v1891_v44 = vpack.c.bf16 %v5285_v41, %v5283_v39 }
 0xfc0   :  { %3802 = vmatmul.mubr.msk.bf16.vlgmr.msra.gmra.mrb[48].mxu0 %vm188_vm0, %v1891_v44  ;;  %4167 = vmatmul.mubr.msk.bf16.vlgmr.msra.gmra.mrb[48].mxu1 %vm188_vm0, %v1891_v44 }
 0xfc1   :  { %2004 = vmatpush1.bf16.msra.mxu0 %v4487_v42  ;;  %2035 = vmatprep.mubr.bf16.mxu0 %v4790_v0 }
 0xfc2   :  { %2005 = vmatprep.subr.bf16.mxu0 %v4492_v45  ;;  %4381 = vmatpush3.bf16.msra.mxu1 %v4996_v49 }
 0xfc3   :  { %4383 = vmatprep.subr.bf16.mxu1 %v5010_v52 }
 0xfc5   :  { %2006 = vmatpush1.bf16.msra.mxu0 %v4490_v46 }
 0xfc6   :  { %4371 = vmatprep.subr.bf16.mxu0 %v4947_v14  ;;  %4385 = vmatpush3.bf16.msra.mxu1 %v5010_v52 }
 0xfc7   :  { %4395 = vmatprep.subr.bf16.mxu1 %v4996_v49 }
 0xfc8   :  { %3803 = vmatmul.mubr.msk.bf16.vlgmr.msra.gmra.mrb[52].mxu0 %vm188_vm0, %v1891_v44 }
 0xfc9   :  { %4373 = vmatpush3.bf16.msra.mxu0 %v4947_v14 }
 0xfca   :  { %4375 = vmatprep.subr.bf16.mxu0 %v4957_v17 }
 0xfcd   :  { %4377 = vmatpush3.bf16.msra.mxu0 %v4957_v17 }
 0xfce   :  { %4387 = vmatprep.subr.bf16.mxu0 %v4947_v14 }
0x1093   :  { %v1994_v47 = vpop.f32.mrb[48].mxu0  ;;  %v5302_v48 = vpop.f32.mrb[48].mxu1 }
0x1094   :  { %v2087_v29 = vmul.f32 %v4637_v50, %v1994_v47  ;;  %v1996_v51 = vpop.f32.mrb[49].mxu0  ;;  %v4168_v13 = vpop.f32.mrb[49].mxu1 }
0x1095   :  { %v2089_v31 = vmul.f32 %v4638_v21, %v1996_v51  ;;  %v1998_v25 = vpop.f32.mrb[50].mxu0  ;;  %v5304_v53 = vpop.f32.mrb[50].mxu1 }
0x1096   :  { %v2088_v54 = vmul.f32 %v4637_v50, %v1998_v25  ;;  %v2000_v55 = vpop.f32.mrb[51].mxu0  ;;  %v4169_v56 = vpop.f32.mrb[51].mxu1  ;;  %v5357_v25 = vpack.c.bf16 %v5302_v48, %v5302_v48 }
0x1097   :  { %v5306_v57 = vadd.f32 %v2089_v31, %v2087_v29  ;;  %v2090_v58 = vmul.f32 %v4638_v21, %v2000_v55  ;;  %v5353_v31 = vpack.c.bf16 %v5304_v53, %v5304_v53 }
0x1098   :  { %v2569_v53 = vsel %vm801_vm3, %v5357_v25, 0 }
0x1099   :  { %v2099_v59 = vmul.f32 %v5306_v57, %v5306_v57  ;;  %v2092_v60 = vadd.f32 %v2090_v58, %v2088_v54  ;;  %v2615_v56 = vsel %vm801_vm3, %v5353_v31, 0 }
0x109b   :  { %v2100_v24 = vmul.f32 %v2092_v60, %v2092_v60  ;;  %v2037_v33 = vpop.f32.mrb[52].mxu0  ;;  %4178 = vmatprep.mubr.msk.f32.mxu0 %vm188_vm0, %v2099_v59 }
0x109c   :  { %v2093_v23 = vmul.f32 %v4637_v50, %v2037_v33  ;;  %v2039_v32 = vpop.f32.mrb[53].mxu0 }
0x109d   :  { %v2095_v62 = vmul.f32 %v4638_v21, %v2039_v32  ;;  %v2041_v63 = vpop.f32.mrb[54].mxu0  ;;  %4179 = vmatmul.mubr.msk.f32.vlgmr.msra.gmra.mrb[56].mxu0 %vm188_vm0, %v2100_v24 }
0x109e   :  { %v2094_v3 = vmul.f32 %v4637_v50, %v2041_v63  ;;  %v2043_v4 = vpop.f32.mrb[55].mxu0  ;;  %4389 = vmatpush3.bf16.msra.mxu0 %v4947_v14 }
0x109f   :  { %v2097_v5 = vadd.f32 %v2095_v62, %v2093_v23  ;;  %v2096_v6 = vmul.f32 %v4638_v21, %v2043_v4  ;;  %4391 = vmatprep.subr.bf16.mxu0 %v4957_v17 }
0x10a1   :  { %v2275_v7 = vmul.f32 %v2097_v5, %v2097_v5  ;;  %v2098_v12 = vadd.f32 %v2096_v6, %v2094_v3 }
0x10a2   :  { %4393 = vmatpush3.bf16.msra.mxu0 %v4957_v17 }
0x10a3   :  { %v2276_v15 = vmul.f32 %v2098_v12, %v2098_v12  ;;  %4200 = vmatprep.mubr.msk.f32.mxu0 %vm188_vm0, %v2275_v7  ;;  %4214 = vmatprep.subr.bf16.mxu0 %v4791_v19 }
0x10a5   :  { %4201 = vmatmul.mubr.msk.f32.vlgmr.msra.gmra.mrb[58].mxu0 %vm188_vm0, %v2276_v15 }
0x10a6   :  { %4216 = vmatprep.mubr.msk.bf16.mxu0 %vm4792_vm1, %v4791_v19 }
0x1170   :  { %v4180_v18 = vpop.f32.mrb[56].mxu0 }
0x1171   :  { %v2183_v14 = vmax.f32 %v4180_v18, 1e-12  ;;  %v2173_v20 = vpop.f32.mrb[57].mxu0 }
0x1172   :  { %v2182_v11 = vmax.f32 %v2173_v20, 1e-12 }
0x1174   :  { %4571 = vrsqrt.f32 %v2182_v11 }
0x1175   :  { %4573 = vrsqrt.f32 %v2183_v14 }
0x1178   :  { %v4202_v26 = vpop.f32.mrb[58].mxu0 }
0x1179   :  { %v2359_v27 = vmax.f32 %v4202_v26, 1e-12  ;;  %v2349_v22 = vpop.f32.mrb[59].mxu0 }
0x117a   :  { %v2358_v17 = vmax.f32 %v2349_v22, 1e-12 }
0x117c   :  { %4575 = vrsqrt.f32 %v2358_v17 }
0x117d   :  { %4577 = vrsqrt.f32 %v2359_v27 }
0x117e   :  { %v4572_v1 = vpop.eup %4571 }
0x117f   :  { %v4574_v28 = vpop.eup %4573  ;;  %4189 = vmatprep.mubr.msk.f32.mxu1 %vm188_vm0, %v4572_v1 }
0x1180   :  { %4190 = vmatmul.mubr.msk.f32.vlgmr.msra.gmra.mrb[52].mxu1 %vm188_vm0, %v4574_v28 }
0x1181   :  { %4397 = vmatpush3.bf16.msra.mxu1 %v4996_v49  ;;  %v5333_v49 = vld [vmem:[%s5604_s7 + $0x8] sm:$0xff] }
0x1182   :  { %4399 = vmatprep.subr.bf16.mxu1 %v5010_v52 }
0x1185   :  { %4401 = vmatpush3.bf16.msra.mxu1 %v5010_v52  ;;  %v2272_v52 = vrot.slane %v5333_v49, %v503_v10 }
0x1186   :  { %v4576_v2 = vpop.eup %4575  ;;  %4220 = vmatprep.subr.bf16.mxu1 %v4791_v19 }
0x1187   :  { %v4578_v30 = vpop.eup %4577  ;;  %4211 = vmatprep.mubr.msk.f32.mxu1 %vm188_vm0, %v4576_v2 }
0x1188   :  { %4212 = vmatmul.mubr.msk.f32.vlgmr.msra.gmra.mrb[54].mxu1 %vm188_vm0, %v4578_v30 }
0x1189   :  { %4222 = vmatprep.mubr.msk.bf16.mxu1 %vm4792_vm1, %v4791_v19 }
0x1253   :  { %v4191_v16 = vpop.f32.mrb[52].mxu1 }
0x1254   :  { %v2258_v34 = vpop.f32.mrb[53].mxu1  ;;  %v2268_v46 = vmul.f32 %v4191_v16, %v2092_v60 }
0x1255   :  { %v2267_v50 = vmul.f32 %v2258_v34, %v5306_v57 }
0x1256   :  { %v2274_v13 = vmul.f32 %v2272_v52, %v2268_v46 }
0x1257   :  { %v2273_v21 = vmul.f32 %v2272_v52, %v2267_v50 }
0x1258   :  { %v5359_v54 = vpack.c.bf16 %v2274_v13, %v2274_v13 }
0x1259   :  { %v5361_v55 = vpack.c.bf16 %v2273_v21, %v2273_v21 }
0x125b   :  { %v4213_v35 = vpop.f32.mrb[54].mxu1 }
0x125c   :  { %v2444_v36 = vmul.f32 %v4213_v35, %v2098_v12  ;;  %v2434_v37 = vpop.f32.mrb[55].mxu1 }
0x125d   :  { %v2443_v42 = vmul.f32 %v2434_v37, %v2097_v5 }
0x125e   :  { %v2446_v44 = vmul.f32 %v2444_v36, %v2272_v52 }
0x125f   :  { %v2445_v45 = vmul.f32 %v2443_v42, %v2272_v52 }
0x1260   :  { %v5338_v47 = vpack.c.bf16 %v2446_v44, %v2446_v44 }
0x1261   :  { %v5341_v29 = vpack.c.bf16 %v2445_v45, %v2445_v45 }
0x1262   :  { %v2503_v51 = vsel %vm685_vm2, %v5338_v47, 0 }
0x1263   :  { %4221 = vmatpush3.bf16.xpose.msra.mxu1 %v2503_v51  ;;  %2661 = vrot.lane.b32.xlu1 %v5341_v29, %s4793_s12  ;;  %v2457_v10 = vsel %vm685_vm2, %v5341_v29, 0 }
0x1264   :  { %4215 = vmatpush3.bf16.xpose.msra.mxu0 %v2457_v10  ;;  %4232 = vmatprep.subr.bf16.mxu1 %v4791_v19 }
0x1265   :  { %4226 = vmatprep.subr.bf16.mxu0 %v4791_v19 }
0x126a   :  { %4223 = vmatmul.mubr.msk.bf16.vlgmr.msra.gmra.mrb[56].mxu1 %vm685_vm2, %v5359_v54 }
0x126b   :  { %4217 = vmatmul.mubr.msk.bf16.vlgmr.msra.gmra.mrb[60].mxu0 %vm685_vm2, %v5361_v55  ;;  %4233 = vmatpush3.bf16.msra.mxu1 %v2615_v56 }
0x126c   :  { %4227 = vmatpush3.bf16.msra.mxu0 %v2569_v53  ;;  %4234 = vmatprep.mubr.msk.bf16.mxu1 %vm4792_vm1, %v4791_v19 }
0x126d   :  { %4244 = vmatprep.subr.bf16.mxu1 %v4791_v19  ;;  %4228 = vmatprep.mubr.msk.bf16.mxu0 %vm4792_vm1, %v4791_v19 }
0x126e   :  { %4238 = vmatprep.subr.bf16.mxu0 %v4791_v19 }
0x12d5   :  { %v2662_v18 = vpop.permute.xlu1 %2661 }
0x12d6   :  { %v2667_v34 = vsel %vm685_vm2, %v2662_v18, 0 }
0x133d   :  { %v2539_v48 = vpop.f32.mrb[56].mxu1 }
0x133e   :  { %v2546_v57 = vmul.f32 2.828427, %v2539_v48  ;;  %v2493_v58 = vpop.f32.mrb[60].mxu0  ;;  %v4224_v59 = vpop.f32.mrb[57].mxu1 }
0x133f   :  { %v2545_v60 = vmul.f32 2.828427, %v2493_v58  ;;  %v4218_v24 = vpop.f32.mrb[61].mxu0  ;;  %v2542_v33 = vpop.f32.mrb[58].mxu1 }
0x1340   :  { %v2548_v23 = vadd.f32 %v2546_v57, %v5085_v38  ;;  %v2496_v32 = vpop.f32.mrb[62].mxu0  ;;  %v4225_v62 = vpop.f32.mrb[59].mxu1 }
0x1341   :  { %v2547_v63 = vadd.f32 %v2545_v60, %v5085_v38  ;;  %v4219_v3 = vpop.f32.mrb[63].mxu0 }
0x1342   :  { %v2551_v4 = vmul.f32 1.442695, %v2548_v23 }
0x1343   :  { %v2549_v5 = vmul.f32 1.442695, %v2547_v63 }
0x1344   :  { %4579 = vpow2.f32 %v2551_v4 }
0x1345   :  { %4581 = vpow2.f32 %v2549_v5 }
0x134e   :  { %v4580_v6 = vpop.eup %4579 }
0x134f   :  { %v4582_v7 = vpop.eup %4581  ;;  %v2556_v12 = vsel %vm685_vm2, %v4580_v6, 0.0 }
0x1350   :  { %2557 = vadd.xlane.f32.xlu0 %v2556_v12  ;;  %v2553_v15 = vsel %vm685_vm2, %v4582_v7, 0.0 }
0x1351   :  { %2554 = vadd.xlane.f32.xlu1 %v2553_v15 }
0x1362   :  { %2658 = vrot.lane.b32.xlu1 %v5361_v55, %s4793_s12 }
0x1366   :  { %2713 = vrot.lane.b32.xlu0 %v5338_v47, %s4793_s12  ;;  %2710 = vrot.lane.b32.xlu1 %v5359_v54, %s4793_s12 }
0x136a   :  { %2782 = vrot.lane.b32.xlu0 %v5357_v25, %s4793_s12  ;;  %2831 = vrot.lane.b32.xlu1 %v5353_v31, %s4793_s12 }
0x13dd   :  { %v2558_v14 = vpop.xlane.xlu0 %2557 }
0x13de   :  { %4583 = vrcp.f32 %v2558_v14  ;;  %v2555_v20 = vpop.xlane.xlu1 %2554 }
0x13df   :  { %4585 = vrcp.f32 %v2555_v20 }
0x13e1   :  { %v2714_v1 = vpop.permute.xlu0 %2713 }
0x13e2   :  { %v2659_v11 = vpop.permute.xlu1 %2658  ;;  %v2719_v16 = vsel %vm685_vm2, %v2714_v1, 0 }
0x13e5   :  { %v2783_v52 = vpop.permute.xlu0 %2782 }
0x13e6   :  { %v2711_v2 = vpop.permute.xlu1 %2710  ;;  %v2788_v37 = vsel %vm801_vm3, %v2783_v52, 0 }
0x13e8   :  { %v4584_v26 = vpop.eup %4583 }
0x13e9   :  { %v4586_v27 = vpop.eup %4585  ;;  %v2562_v22 = vmul.f32 %v4584_v26, %v4580_v6 }
0x13ea   :  { %v2561_v17 = vmul.f32 %v4586_v27, %v4582_v7  ;;  %v2832_v35 = vpop.permute.xlu1 %2831 }
0x13eb   :  { %v2564_v28 = vpack.c.bf16 %v2562_v22, %v2562_v22  ;;  %v2837_v36 = vsel %vm801_vm3, %v2832_v35, 0 }
0x13ec   :  { %v2563_v30 = vpack.c.bf16 %v2561_v17, %v2561_v17 }
0x13ed   :  { %4235 = vmatmul.mubr.msk.bf16.vlgmr.msra.gmra.mrb[60].mxu1 %vm685_vm2, %v2564_v28 }
0x13ee   :  { %4245 = vmatpush3.bf16.xpose.msra.mxu1 %v2719_v16  ;;  %4229 = vmatmul.mubr.msk.bf16.vlgmr.msra.gmra.mrb[64].mxu0 %vm685_vm2, %v2563_v30 }
0x13ef   :  { %4239 = vmatpush3.bf16.xpose.msra.mxu0 %v2667_v34  ;;  %4246 = vmatprep.mubr.msk.bf16.mxu1 %vm4792_vm1, %v4791_v19 }
0x13f0   :  { %4256 = vmatprep.subr.bf16.mxu1 %v4791_v19  ;;  %4240 = vmatprep.mubr.msk.bf16.mxu0 %vm4792_vm1, %v4791_v19 }
0x13f1   :  { %4250 = vmatprep.subr.bf16.mxu0 %v4791_v19 }
0x13f5   :  { %4247 = vmatmul.mubr.msk.bf16.vlgmr.msra.gmra.mrb[64].mxu1 %vm685_vm2, %v2711_v2 }
0x13f6   :  { %4257 = vmatpush3.bf16.msra.mxu1 %v2837_v36  ;;  %4241 = vmatmul.mubr.msk.bf16.vlgmr.msra.gmra.mrb[68].mxu0 %vm685_vm2, %v2659_v11 }
0x13f7   :  { %4251 = vmatpush3.bf16.msra.mxu0 %v2788_v37  ;;  %4258 = vmatprep.mubr.msk.bf16.mxu1 %vm4792_vm1, %v4791_v19 }
0x13f8   :  { %4268 = vmatprep.subr.bf16.mxu1 %v4791_v19  ;;  %4252 = vmatprep.mubr.msk.bf16.mxu0 %vm4792_vm1, %v4791_v19 }
0x13f9   :  { %4262 = vmatprep.subr.bf16.mxu0 %v4791_v19 }
0x14c0   :  { %v5411_v42 = vpop.f32.mrb[60].mxu1 }
0x14c1   :  { %v5413_v44 = vpop.f32.mrb[64].mxu0  ;;  %v4236_v45 = vpop.f32.mrb[61].mxu1 }
0x14c2   :  { %v4230_v46 = vpop.f32.mrb[65].mxu0  ;;  %v2654_v50 = vpop.f32.mrb[62].mxu1 }
0x14c3   :  { %v2608_v51 = vpop.f32.mrb[66].mxu0  ;;  %v4237_v10 = vpop.f32.mrb[63].mxu1 }
0x14c4   :  { %v4231_v13 = vpop.f32.mrb[67].mxu0 }
0x14c8   :  { %v2755_v21 = vpop.f32.mrb[64].mxu1 }
0x14c9   :  { %v2762_v56 = vmul.f32 2.828427, %v2755_v21  ;;  %v2703_v53 = vpop.f32.mrb[68].mxu0  ;;  %v4248_v48 = vpop.f32.mrb[65].mxu1 }
0x14ca   :  { %v2761_v57 = vmul.f32 2.828427, %v2703_v53  ;;  %v4242_v58 = vpop.f32.mrb[69].mxu0  ;;  %v2758_v59 = vpop.f32.mrb[66].mxu1 }
0x14cb   :  { %v2764_v60 = vadd.f32 %v2762_v56, %v5085_v38  ;;  %v2706_v24 = vpop.f32.mrb[70].mxu0  ;;  %v4249_v33 = vpop.f32.mrb[67].mxu1 }
0x14cc   :  { %v2763_v23 = vadd.f32 %v2761_v57, %v5085_v38  ;;  %v4243_v32 = vpop.f32.mrb[71].mxu0 }
0x14cd   :  { %v2767_v62 = vmul.f32 1.442695, %v2764_v60 }
0x14ce   :  { %v2765_v63 = vmul.f32 1.442695, %v2763_v23 }
0x14cf   :  { %4587 = vpow2.f32 %v2767_v62 }
0x14d0   :  { %4589 = vpow2.f32 %v2765_v63 }
0x14d9   :  { %v4588_v3 = vpop.eup %4587 }
0x14da   :  { %v4590_v4 = vpop.eup %4589  ;;  %v2772_v5 = vsel %vm685_vm2, %v4588_v3, 0.0 }
0x14db   :  { %2773 = vadd.xlane.f32.xlu1 %v2772_v5  ;;  %v2769_v6 = vsel %vm685_vm2, %v4590_v4, 0.0 }
0x14dc   :  { %2770 = vadd.xlane.f32.xlu0 %v2769_v6 }
0x14ec   :  { %2931 = vrot.lane.b32.xlu1 %v5338_v47, %s4794_s27 }
0x14f0   :  { %2929 = vrot.lane.b32.xlu1 %v5359_v54, %s4794_s27 }
0x14f2   :  { %2881 = vrot.lane.b32.xlu0 %v5341_v29, %s4794_s27 }
0x14f4   :  { %3047 = vrot.lane.b32.xlu1 %v5353_v31, %s4794_s27 }
0x14f6   :  { %2879 = vrot.lane.b32.xlu0 %v5361_v55, %s4794_s27 }
0x14fa   :  { %2999 = vrot.lane.b32.xlu0 %v5357_v25, %s4794_s27 }
0x1568   :  { %v2774_v7 = vpop.xlane.xlu1 %2773 }
0x1569   :  { %4591 = vrcp.f32 %v2774_v7  ;;  %v2771_v12 = vpop.xlane.xlu0 %2770 }
0x156a   :  { %4593 = vrcp.f32 %v2771_v12 }
0x156c   :  { %v2932_v15 = vpop.permute.xlu1 %2931 }
0x156d   :  { %v2882_v18 = vpop.permute.xlu0 %2881  ;;  %v2937_v1 = vsel %vm685_vm2, %v2932_v15, 0 }
0x156e   :  { %v2887_v2 = vsel %vm685_vm2, %v2882_v18, 0 }
0x1570   :  { %v2930_v22 = vpop.permute.xlu1 %2929 }
0x1571   :  { %v2880_v28 = vpop.permute.xlu0 %2879 }
0x1573   :  { %v4592_v14 = vpop.eup %4591 }
0x1574   :  { %v4594_v20 = vpop.eup %4593  ;;  %v2778_v11 = vmul.f32 %v4592_v14, %v4588_v3  ;;  %v3048_v30 = vpop.permute.xlu1 %3047 }
0x1575   :  { %v2777_v26 = vmul.f32 %v4594_v20, %v4590_v4  ;;  %v3000_v16 = vpop.permute.xlu0 %2999  ;;  %v3053_v34 = vsel %vm801_vm3, %v3048_v30, 0 }
0x1576   :  { %v2780_v27 = vpack.c.bf16 %v2778_v11, %v2778_v11  ;;  %v3005_v35 = vsel %vm801_vm3, %v3000_v16, 0 }
0x1577   :  { %v2779_v17 = vpack.c.bf16 %v2777_v26, %v2777_v26 }
0x1578   :  { %4259 = vmatmul.mubr.msk.bf16.vlgmr.msra.gmra.mrb[68].mxu1 %vm685_vm2, %v2780_v27 }
0x1579   :  { %4269 = vmatpush3.bf16.xpose.msra.mxu1 %v2937_v1  ;;  %4253 = vmatmul.mubr.msk.bf16.vlgmr.msra.gmra.mrb[72].mxu0 %vm685_vm2, %v2779_v17 }
0x157a   :  { %4263 = vmatpush3.bf16.xpose.msra.mxu0 %v2887_v2  ;;  %4270 = vmatprep.mubr.msk.bf16.mxu1 %vm4792_vm1, %v4791_v19 }
0x157b   :  { %4280 = vmatprep.subr.bf16.mxu1 %v4791_v19  ;;  %4264 = vmatprep.mubr.msk.bf16.mxu0 %vm4792_vm1, %v4791_v19 }
0x157c   :  { %4274 = vmatprep.subr.bf16.mxu0 %v4791_v19 }
0x1580   :  { %4271 = vmatmul.mubr.msk.bf16.vlgmr.msra.gmra.mrb[72].mxu1 %vm685_vm2, %v2930_v22 }
0x1581   :  { %4281 = vmatpush3.bf16.msra.mxu1 %v3053_v34  ;;  %4265 = vmatmul.mubr.msk.bf16.vlgmr.msra.gmra.mrb[76].mxu0 %vm685_vm2, %v2880_v28 }
0x1582   :  { %4275 = vmatpush3.bf16.msra.mxu0 %v3005_v35  ;;  %4282 = vmatprep.mubr.msk.bf16.mxu1 %vm4792_vm1, %v4791_v19 }
0x1583   :  { %4292 = vmatprep.subr.bf16.mxu1 %v4791_v19  ;;  %4276 = vmatprep.mubr.msk.bf16.mxu0 %vm4792_vm1, %v4791_v19 }
0x1584   :  { %4286 = vmatprep.subr.bf16.mxu0 %v4791_v19 }
0x164b   :  { %v5451_v52 = vpop.f32.mrb[68].mxu1 }
0x164c   :  { %v5453_v36 = vpop.f32.mrb[72].mxu0  ;;  %v4260_v37 = vpop.f32.mrb[69].mxu1 }
0x164d   :  { %v4438_v45 = vpack.i.bf16 %v5451_v52, %v5453_v36  ;;  %v4254_v46 = vpop.f32.mrb[73].mxu0  ;;  %v2876_v50 = vpop.f32.mrb[70].mxu1 }
0x164e   :  { %v2827_v51 = vpop.f32.mrb[74].mxu0  ;;  %v4261_v10 = vpop.f32.mrb[71].mxu1 }
0x164f   :  { %v4255_v13 = vpop.f32.mrb[75].mxu0 }
0x1653   :  { %v2973_v21 = vpop.f32.mrb[72].mxu1 }
0x1654   :  { %v2980_v56 = vmul.f32 2.828427, %v2973_v21  ;;  %v2923_v53 = vpop.f32.mrb[76].mxu0  ;;  %v4272_v48 = vpop.f32.mrb[73].mxu1 }
0x1655   :  { %v2979_v57 = vmul.f32 2.828427, %v2923_v53  ;;  %v4266_v58 = vpop.f32.mrb[77].mxu0  ;;  %v2976_v59 = vpop.f32.mrb[74].mxu1 }
0x1656   :  { %v2982_v60 = vadd.f32 %v2980_v56, %v5085_v38  ;;  %v2926_v24 = vpop.f32.mrb[78].mxu0  ;;  %v4273_v33 = vpop.f32.mrb[75].mxu1 }
0x1657   :  { %v2981_v23 = vadd.f32 %v2979_v57, %v5085_v38  ;;  %v4267_v32 = vpop.f32.mrb[79].mxu0 }
0x1658   :  { %v2985_v62 = vmul.f32 1.442695, %v2982_v60 }
0x1659   :  { %v2983_v63 = vmul.f32 1.442695, %v2981_v23 }
0x165a   :  { %4595 = vpow2.f32 %v2985_v62 }
0x165b   :  { %4597 = vpow2.f32 %v2983_v63 }
0x1664   :  { %v4596_v3 = vpop.eup %4595 }
0x1665   :  { %v4598_v4 = vpop.eup %4597  ;;  %v2990_v5 = vsel %vm685_vm2, %v4596_v3, 0.0 }
0x1666   :  { %2991 = vadd.xlane.f32.xlu1 %v2990_v5  ;;  %v2987_v6 = vsel %vm685_vm2, %v4598_v4, 0.0 }
0x1667   :  { %2988 = vadd.xlane.f32.xlu0 %v2987_v6 }
0x1677   :  { %3147 = vrot.lane.b32.xlu1 %v5338_v47, %s4796_s28 }
0x167b   :  { %3145 = vrot.lane.b32.xlu1 %v5359_v54, %s4796_s28 }
0x167d   :  { %3097 = vrot.lane.b32.xlu0 %v5341_v29, %s4796_s28 }
0x1681   :  { %3095 = vrot.lane.b32.xlu0 %v5361_v55, %s4796_s28 }
0x16f3   :  { %v2992_v7 = vpop.xlane.xlu1 %2991 }
0x16f4   :  { %4599 = vrcp.f32 %v2992_v7  ;;  %v2989_v12 = vpop.xlane.xlu0 %2988 }
0x16f5   :  { %4601 = vrcp.f32 %v2989_v12 }
0x16f7   :  { %v3148_v11 = vpop.permute.xlu1 %3147 }
0x16f8   :  { %v3098_v26 = vpop.permute.xlu0 %3097  ;;  %v3153_v54 = vsel %vm685_vm2, %v3148_v11, 0 }
0x16f9   :  { %v3103_v29 = vsel %vm685_vm2, %v3098_v26, 0 }
0x16fb   :  { %v3146_v55 = vpop.permute.xlu1 %3145 }
0x16fc   :  { %v3096_v22 = vpop.permute.xlu0 %3095 }
0x16fe   :  { %v4600_v15 = vpop.eup %4599 }
0x16ff   :  { %v4602_v18 = vpop.eup %4601  ;;  %v2996_v14 = vmul.f32 %v4600_v15, %v4596_v3  ;;  %v4494_v15 = vld [vmem:[%s5601_s4 + $0x18] sm:$0xff]  }
0x1700   :  { %v2995_v20 = vmul.f32 %v4602_v18, %v4598_v4 }
0x1701   :  { %v2998_v47 = vpack.c.bf16 %v2996_v14, %v2996_v14 }
0x1702   :  { %v2997_v27 = vpack.c.bf16 %v2995_v20, %v2995_v20 }
0x1703   :  { %4283 = vmatmul.mubr.msk.bf16.vlgmr.msra.gmra.mrb[76].mxu1 %vm685_vm2, %v2998_v47 }
0x1704   :  { %4293 = vmatpush3.bf16.xpose.msra.mxu1 %v3153_v54  ;;  %4277 = vmatmul.mubr.msk.bf16.vlgmr.msra.gmra.mrb[80].mxu0 %vm685_vm2, %v2997_v27 }
0x1705   :  { %4287 = vmatpush3.bf16.xpose.msra.mxu0 %v3103_v29  ;;  %4294 = vmatprep.mubr.msk.bf16.mxu1 %vm4792_vm1, %v4791_v19 }
0x1706   :  { %4288 = vmatprep.mubr.msk.bf16.mxu0 %vm4792_vm1, %v4791_v19  ;;  %4304 = vmatprep.subr.bf16.mxu1 %v4791_v19 }
0x1707   :  { %4298 = vmatprep.subr.bf16.mxu0 %v4791_v19 }
0x170b   :  { %4295 = vmatmul.mubr.msk.bf16.vlgmr.msra.gmra.mrb[80].mxu1 %vm685_vm2, %v3146_v55 }
0x170c   :  { %4289 = vmatmul.mubr.msk.bf16.vlgmr.msra.gmra.mrb[84].mxu0 %vm685_vm2, %v3096_v22  ;;  %4306 = vmatprep.mubr.msk.bf16.mxu1 %vm4792_vm1, %v4791_v19 }
0x170d   :  { %4300 = vmatprep.mubr.msk.bf16.mxu0 %vm4792_vm1, %v4791_v19 }
0x17d6   :  { %v3089_v17 = vpop.f32.mrb[76].mxu1 }
0x17d7   :  { %v3041_v1 = vpop.f32.mrb[80].mxu0  ;;  %v4284_v28 = vpop.f32.mrb[77].mxu1 }
0x17d8   :  { %v4443_v2 = vpack.i.bf16 %v3089_v17, %v3041_v1  ;;  %v4278_v30 = vpop.f32.mrb[81].mxu0  ;;  %v3092_v16 = vpop.f32.mrb[78].mxu1 }
0x17d9   :  { %v3044_v34 = vpop.f32.mrb[82].mxu0  ;;  %v4285_v35 = vpop.f32.mrb[79].mxu1 }
0x17da   :  { %v4279_v37 = vpop.f32.mrb[83].mxu0 }
0x17de   :  { %v3189_v46 = vpop.f32.mrb[80].mxu1 }
0x17df   :  { %v3196_v50 = vmul.f32 2.828427, %v3189_v46  ;;  %v3139_v51 = vpop.f32.mrb[84].mxu0  ;;  %v4296_v10 = vpop.f32.mrb[81].mxu1 }
0x17e0   :  { %v3195_v13 = vmul.f32 2.828427, %v3139_v51  ;;  %v4290_v21 = vpop.f32.mrb[85].mxu0  ;;  %v3192_v56 = vpop.f32.mrb[82].mxu1 }
0x17e1   :  { %v3198_v53 = vadd.f32 %v3196_v50, %v5085_v38  ;;  %v3142_v48 = vpop.f32.mrb[86].mxu0  ;;  %v4297_v57 = vpop.f32.mrb[83].mxu1 }
0x17e2   :  { %v3197_v58 = vadd.f32 %v3195_v13, %v5085_v38  ;;  %v4291_v59 = vpop.f32.mrb[87].mxu0 }
0x17e3   :  { %v3201_v60 = vmul.f32 1.442695, %v3198_v53 }
0x17e4   :  { %v3199_v24 = vmul.f32 1.442695, %v3197_v58 }
0x17e5   :  { %4603 = vpow2.f32 %v3201_v60 }
0x17e6   :  { %4605 = vpow2.f32 %v3199_v24 }
0x17ef   :  { %v4604_v33 = vpop.eup %4603 }
0x17f0   :  { %v4606_v23 = vpop.eup %4605  ;;  %v3206_v32 = vsel %vm685_vm2, %v4604_v33, 0.0 }
0x17f1   :  { %3207 = vadd.xlane.f32.xlu1 %v3206_v32  ;;  %v3203_v62 = vsel %vm685_vm2, %v4606_v23, 0.0  ;;  %v3422_v32 = vrot.slane %v5333_v49, %v1656_v43  ;;  %v4497_v43 = vld [vmem:[#allocation8 + $0x24] ss:$8 sps:$4 sm:$0xff]  }
0x17f2   :  { %3204 = vadd.xlane.f32.xlu0 %v3203_v62 }
0x1802   :  { %3263 = vrot.lane.b32.xlu1 %v5353_v31, %s4796_s28 }
0x1806   :  { %4444 = vrot.lane.b32.xlu1 %v4443_v2, %s4797_s3 }
0x1808   :  { %3215 = vrot.lane.b32.xlu0 %v5357_v25, %s4796_s28 }
0x180c   :  { %4439 = vrot.lane.b32.xlu0 %v4438_v45, %s4782_s22  ;;  %v4493_v45 = vld [vmem:[%s5601_s4 + $0x10] sm:$0xff]  }
0x187e   :  { %v3208_v38 = vpop.xlane.xlu1 %3207 }
0x187f   :  { %4607 = vrcp.f32 %v3208_v38  ;;  %v3205_v63 = vpop.xlane.xlu0 %3204 }
0x1880   :  { %4609 = vrcp.f32 %v3205_v63 }
0x1882   :  { %v3264_v3 = vpop.permute.xlu1 %3263 }
0x1883   :  { %v3269_v4 = vsel %vm801_vm3, %v3264_v3, 0  ;;  %v3216_v5 = vpop.permute.xlu0 %3215 }
0x1884   :  { %v3221_v31 = vsel %vm801_vm3, %v3216_v5, 0  ;;  %4305 = vmatpush3.bf16.msra.mxu1 %v3269_v4 }
0x1885   :  { %4299 = vmatpush3.bf16.msra.mxu0 %v3221_v31  ;;  %3470 = vmatprep.subr.bf16.mxu1 %v4497_v43 }
0x1886   :  { %4310 = vmatprep.subr.bf16.mxu0 %v4791_v19  ;;  %v4445_v17 = vpop.permute.xlu1 %4444 }
0x1887   :  { %v4440_v29 = vpop.permute.xlu0 %4439  ;;  %v4447_v2 = vunpack.i.h.bf16 %v4445_v17  ;;  %v4446_v30 = vunpack.i.l.bf16 %v4445_v17 }
0x1888   :  { %v4442_v55 = vunpack.i.h.bf16 %v4440_v29  ;;  %v4441_v22 = vunpack.i.l.bf16 %v4440_v29  ;;  %v4503_v29 = vld [vmem:[%s5603_s6 + $0x30] sm:$0xff]  }
0x1889   :  { %v4608_v25 = vpop.eup %4607 }
0x188a   :  { %v4610_v6 = vpop.eup %4609  ;;  %v3212_v7 = vmul.f32 %v4608_v25, %v4604_v33  ;;  %v3336_v1 = vsel %vm685_vm2, %v5411_v42, %v4442_v55  ;;  %v3335_v28 = vsel %vm685_vm2, %v5413_v44, %v4441_v22  ;;  %v4504_v55 = vld [vmem:[%s5603_s6 + $0x38] sm:$0xff]   ;;  %v3522_v22 = vrot.slane %v5333_v49, %v1755_v9 }
0x188b   :  { %v3211_v12 = vmul.f32 %v4610_v6, %v4606_v23  ;;  %v3337_v37 = vsel %vm1571_vm5, %v3335_v28, %v4446_v30  ;;  %v3338_v46 = vsel %vm1571_vm5, %v3336_v1, %v4447_v2  ;;  %v3516_v9 = vrot.slane %v5333_v49, %v1749_v40 }
0x188c   :  { %v3214_v52 = vpack.c.bf16 %v3212_v7, %v3212_v7 }
0x188d   :  { %v3213_v36 = vpack.c.bf16 %v3211_v12, %v3211_v12 }
0x188e   :  { %4307 = vmatmul.mubr.msk.bf16.vlgmr.msra.gmra.mrb[84].mxu1 %vm685_vm2, %v3214_v52 }
0x188f   :  { %4301 = vmatmul.mubr.msk.bf16.vlgmr.msra.gmra.mrb[88].mxu0 %vm685_vm2, %v3213_v36  ;;  %3502 = vmatprep.mubr.bf16.mxu1 %v4790_v0  ;;  %v4495_v36 = vld [vmem:[#allocation8 + $0x20] ss:$8 sps:$4 sm:$0xff]  }
0x1890   :  { %4314 = vmatprep.mubr.msk.bf16.mxu0 %vm4792_vm1, %v4791_v19  ;;  %4311 = vmatpush3.bf16.msra.mxu0 %v4493_v45  ;;  %v4500_v45 = vld [vmem:[#allocation8 + $0x34] ss:$8 sps:$4 sm:$0xff]  }
0x1891   :  { %4312 = vmatprep.subr.bf16.mxu0 %v4791_v19  ;;  %3471 = vmatpush1.bf16.msra.mxu1 %v4495_v36 }
0x1892   :  { %3472 = vmatprep.subr.bf16.mxu1 %v4500_v45 }
0x1894   :  { %4313 = vmatpush3.bf16.msra.mxu0 %v4494_v15  ;;  %v4498_v15 = vld [vmem:[#allocation8 + $0x30] ss:$8 sps:$4 sm:$0xff]  }
0x1895   :  { %4318 = vmatprep.subr.bf16.mxu0 %v4791_v19  ;;  %3473 = vmatpush1.bf16.msra.mxu1 %v4498_v15 }
0x1896   :  { %4330 = vmatprep.subr.bf16.mxu1 %v4791_v19 }
0x1961   :  { %v3305_v18 = vpop.f32.mrb[84].mxu1 }
0x1962   :  { %v3257_v14 = vpop.f32.mrb[88].mxu0  ;;  %v4308_v0 = vpop.f32.mrb[85].mxu1 }
0x1963   :  { %v4448_v20 = vpack.i.bf16 %v3305_v18, %v3257_v14  ;;  %v4302_v11 = vpop.f32.mrb[89].mxu0  ;;  %v3308_v26 = vpop.f32.mrb[86].mxu1 }
0x1964   :  { %v3260_v47 = vpop.f32.mrb[90].mxu0  ;;  %v4309_v27 = vpop.f32.mrb[87].mxu1 }
0x1965   :  { %4449 = vrot.lane.b32.xlu0 %v4448_v20, %s4798_s11  ;;  %v4303_v54 = vpop.f32.mrb[91].mxu0  ;;  %v4501_v27 = vld [vmem:[%s5603_s6 + $0x20] sm:$0xff]  }
0x1966   :  { %v4502_v54 = vld [vmem:[%s5603_s6 + $0x28] sm:$0xff]   ;;  %s4799_s6 = smov [#allocation11]  }
0x1967   :  { %s3723_s17 = sshll.u32 %s4799_s6, 4  ;;  %s3724_s17 = int_to_ptr.vmem [resolvable:$true] %s3723_s17 }
0x1968   :  { %s4749_s29 = scalar_lea.vmem %s3724_s17, 256  ;;  %p4754_p13 = scmp.lt.s32.totalorder %s3724_s17, %s3724_s17 }
0x1969   :  { %p4750_p12 = scmp.ne.s32.totalorder %s3724_s17, %s4749_s29  ;;  %p4755_p0 = scmp.lt.s32.totalorder %s4749_s29, %s4749_s29 }
0x196b   :  { %p4756_p1 = por %p4755_p0, %p4754_p13 }
0x196d   :  { %p4757_p2 = pnand %p4756_p1, %p4750_p12 }
0x19d7   :  { %v4450_v16 = vpop.permute.xlu0 %4449 }
0x19d8   :  { %v4452_v34 = vunpack.i.h.bf16 %v4450_v16  ;;  %v4451_v35 = vunpack.i.l.bf16 %v4450_v16 }
0x19da   :  { %v3340_v50 = vsel %vm1574_vm6, %v3338_v46, %v4452_v34  ;;  %v3339_v51 = vsel %vm1574_vm6, %v3337_v37, %v4451_v35 }
0x19db   :  { %v3341_v10 = vpack.c.bf16 %v3340_v50, %v3339_v51 }
0x19dd   :  { %4315 = vmatmul.mubr.msk.bf16.vlgmr.msra.gmra.mrb[92].mxu0 %vm188_vm0, %v3341_v10 }
0x19de   :  { %4326 = vmatprep.mubr.msk.bf16.mxu0 %vm4792_vm1, %v4791_v19  ;;  %4319 = vmatpush3.bf16.msra.mxu0 %v4501_v27 }
0x19df   :  { %4320 = vmatprep.subr.bf16.mxu0 %v4791_v19 }
0x19e2   :  { %4321 = vmatpush3.bf16.msra.mxu0 %v4502_v54 }
0x19e3   :  { %4322 = vmatprep.subr.bf16.mxu0 %v4791_v19 }
0x19e6   :  { %4323 = vmatpush3.bf16.msra.mxu0 %v4503_v29 }
0x19e7   :  { %4324 = vmatprep.subr.bf16.mxu0 %v4791_v19 }
0x19ea   :  { %4325 = vmatpush3.bf16.msra.mxu0 %v4504_v55 }
0x1ab0   :  { %v3396_v42 = vpop.f32.mrb[92].mxu0 }
0x1ab1   :  { %v3403_v44 = vmul.f32 %v3396_v42, %v3396_v42  ;;  %v4316_v13 = vpop.f32.mrb[93].mxu0 }
0x1ab2   :  { %v3399_v21 = vpop.f32.mrb[94].mxu0 }
0x1ab3   :  { %v3404_v56 = vmul.f32 %v3399_v21, %v3399_v21  ;;  %v4317_v53 = vpop.f32.mrb[95].mxu0  ;;  %v3405_v48 = vsel %vm188_vm0, %v3403_v44, 0.0 }
0x1ab4   :  { %3406 = vadd.xlane.f32.xlu1 %v3405_v48 }
0x1ab5   :  { %v3408_v57 = vsel %vm188_vm0, %v3404_v56, 0.0 }
0x1ab6   :  { %3409 = vadd.xlane.f32.xlu0 %v3408_v57 }
0x1b41   :  { %v3407_v58 = vpop.xlane.xlu1 %3406 }
0x1b42   :  { %v3411_v59 = vmax.f32 %v3407_v58, 1e-12 }
0x1b43   :  { %v3410_v60 = vpop.xlane.xlu0 %3409 }
0x1b44   :  { %4611 = vrsqrt.f32 %v3411_v59  ;;  %v3412_v24 = vmax.f32 %v3410_v60, 1e-12 }
0x1b46   :  { %4613 = vrsqrt.f32 %v3412_v24 }
0x1b4e   :  { %v4612_v33 = vpop.eup %4611 }
0x1b4f   :  { %v3415_v23 = vmul.f32 %v4612_v33, %v3396_v42 }
0x1b50   :  { %v4614_v62 = vpop.eup %4613 }
0x1b51   :  { %v3417_v38 = vsub.f32 %v3415_v23, %v5283_v39  ;;  %v3416_v63 = vmul.f32 %v4614_v62, %v3399_v21 }
0x1b53   :  { %v3423_v3 = vmul.f32 %v3422_v32, %v3417_v38  ;;  %v3418_v4 = vsub.f32 %v3416_v63, %v5285_v41 }
0x1b55   :  { %v3425_v5 = vadd.f32 %v3423_v3, %v5283_v39  ;;  %v3424_v31 = vmul.f32 %v3422_v32, %v3418_v4 }
0x1b57   :  { %v3427_v25 = vmul.f32 %v3425_v5, %v3425_v5  ;;  %v3426_v6 = vadd.f32 %v3424_v31, %v5285_v41 }
0x1b59   :  { %v3429_v7 = vsel %vm188_vm0, %v3427_v25, 0.0  ;;  %v3428_v12 = vmul.f32 %v3426_v6, %v3426_v6 }
0x1b5a   :  { %3430 = vadd.xlane.f32.xlu0 %v3429_v7 }
0x1b5b   :  { %v3432_v52 = vsel %vm188_vm0, %v3428_v12, 0.0 }
0x1b5c   :  { %3433 = vadd.xlane.f32.xlu1 %v3432_v52 }
0x1be7   :  { %v3431_v39 = vpop.xlane.xlu0 %3430 }
0x1be8   :  { %v3435_v18 = vmax.f32 %v3431_v39, 1e-12 }
0x1be9   :  { %v3434_v41 = vpop.xlane.xlu1 %3433 }
0x1bea   :  { %4615 = vrsqrt.f32 %v3435_v18  ;;  %v3436_v14 = vmax.f32 %v3434_v41, 1e-12 }
0x1bec   :  { %4617 = vrsqrt.f32 %v3436_v14 }
0x1bf4   :  { %v4616_v0 = vpop.eup %4615 }
0x1bf5   :  { %v5538_v11 = vmul.f32 %v4616_v0, %v3425_v5 }
0x1bf6   :  { %v4618_v20 = vpop.eup %4617 }
0x1bf7   :  { %v5540_v26 = vmul.f32 %v4618_v20, %v3426_v6  ;;  %v3636_v6 = vrot.slane %v5333_v49, %v1869_v61  ;;  %v4505_v61 = vld [vmem:[#allocation10] sm:$0xff]   ;;  %v4506_v49 = vld [vmem:[#allocation10 + $0x8] sm:$0xff]  }
0x1bf9   :  { %v3441_v47 = vpack.c.bf16 %v5540_v26, %v5538_v11 }
0x1bfb   :  { %3840 = vmatmul.mubr.msk.bf16.vlgmr.msra.gmra.mrb[88].mxu1 %vm188_vm0, %v3441_v47 }
0x1bfc   :  { %4334 = vmatprep.mubr.msk.bf16.mxu1 %vm4792_vm1, %v4791_v19  ;;  %4331 = vmatpush3.bf16.msra.mxu1 %v4505_v61 }
0x1bfd   :  { %4332 = vmatprep.subr.bf16.mxu1 %v4791_v19 }
0x1c00   :  { %4333 = vmatpush3.bf16.msra.mxu1 %v4506_v49 }
0x1cce   :  { %v3504_v17 = vpop.f32.mrb[88].mxu1 }
0x1ccf   :  { %v3506_v1 = vpop.f32.mrb[89].mxu1  ;;  %v3517_v13 = vmul.f32 %v3516_v9, %v3504_v17 }
0x1cd0   :  { %v3523_v28 = vmul.f32 %v3522_v22, %v3506_v1  ;;  %v3508_v2 = vpop.f32.mrb[90].mxu1 }
0x1cd1   :  { %v3510_v30 = vpop.f32.mrb[91].mxu1  ;;  %v3518_v48 = vmul.f32 %v3516_v9, %v3508_v2 }
0x1cd2   :  { %v3525_v16 = vsub.f32 0.0, %v3523_v28  ;;  %v3524_v34 = vmul.f32 %v3522_v22, %v3510_v30 }
0x1cd4   :  { %v3527_v35 = vmul.f32 1.442695, %v3525_v16  ;;  %v3526_v37 = vsub.f32 0.0, %v3524_v34 }
0x1cd6   :  { %4619 = vpow2.f32 %v3527_v35  ;;  %v3529_v46 = vmul.f32 1.442695, %v3526_v37 }
0x1cd8   :  { %4621 = vpow2.f32 %v3529_v46 }
0x1ce0   :  { %v4620_v50 = vpop.eup %4619 }
0x1ce1   :  { %v3531_v51 = vadd.f32 1.0, %v4620_v50 }
0x1ce2   :  { %v4622_v10 = vpop.eup %4621 }
0x1ce3   :  { %4623 = vrcp.f32 %v3531_v51  ;;  %v3532_v42 = vadd.f32 1.0, %v4622_v10 }
0x1ce5   :  { %4625 = vrcp.f32 %v3532_v42 }
0x1ced   :  { %v4624_v44 = vpop.eup %4623 }
0x1cee   :  { %v3535_v21 = vmul.f32 %v4624_v44, %v3523_v28 }
0x1cef   :  { %v4626_v56 = vpop.eup %4625 }
0x1cf0   :  { %v3537_v53 = vmul.f32 %v3535_v21, %v3517_v13  ;;  %v3536_v57 = vmul.f32 %v4626_v56, %v3524_v34 }
0x1cf2   :  { %v3538_v58 = vmul.f32 %v3536_v57, %v3518_v48 }
0x1cf4   :  { %v3539_v59 = vpack.c.bf16 %v3538_v58, %v3537_v53 }
0x1cf6   :  { %4327 = vmatmul.mubr.msk.bf16.vlgmr.msra.gmra.mrb[96].mxu0 %vm1806_vm7, %v3539_v59 }
0x1dc9   :  { %v3610_v60 = vpop.f32.mrb[96].mxu0 }
0x1dca   :  { %v3617_v24 = vmul.f32 %v3610_v60, %v3610_v60  ;;  %v4328_v33 = vpop.f32.mrb[97].mxu0 }
0x1dcb   :  { %v3613_v23 = vpop.f32.mrb[98].mxu0 }
0x1dcc   :  { %v3618_v32 = vmul.f32 %v3613_v23, %v3613_v23  ;;  %v4329_v62 = vpop.f32.mrb[99].mxu0  ;;  %v3619_v38 = vsel %vm188_vm0, %v3617_v24, 0.0 }
0x1dcd   :  { %3620 = vadd.xlane.f32.xlu0 %v3619_v38 }
0x1dce   :  { %v3622_v40 = vsel %vm188_vm0, %v3618_v32, 0.0 }
0x1dcf   :  { %3623 = vadd.xlane.f32.xlu1 %v3622_v40 }
0x1e5a   :  { %v3621_v63 = vpop.xlane.xlu0 %3620 }
0x1e5b   :  { %v3625_v3 = vmax.f32 %v3621_v63, 1e-12 }
0x1e5c   :  { %v3624_v4 = vpop.xlane.xlu1 %3623 }
0x1e5d   :  { %4627 = vrsqrt.f32 %v3625_v3  ;;  %v3626_v5 = vmax.f32 %v3624_v4, 1e-12 }
0x1e5f   :  { %4629 = vrsqrt.f32 %v3626_v5 }
0x1e67   :  { %v4628_v31 = vpop.eup %4627 }
0x1e68   :  { %v3629_v25 = vmul.f32 %v4628_v31, %v3610_v60 }
0x1e69   :  { %v4630_v7 = vpop.eup %4629 }
0x1e6a   :  { %v3631_v12 = vsub.f32 %v3629_v25, %v5538_v11  ;;  %v3630_v52 = vmul.f32 %v4630_v7, %v3613_v23 }
0x1e6c   :  { %v3637_v43 = vmul.f32 %v3636_v6, %v3631_v12  ;;  %v3632_v36 = vsub.f32 %v3630_v52, %v5540_v26 }
0x1e6e   :  { %v3639_v45 = vadd.f32 %v3637_v43, %v5538_v11  ;;  %v3638_v15 = vmul.f32 %v3636_v6, %v3632_v36 }
0x1e70   :  { %v3641_v39 = vmul.f32 %v3639_v45, %v3639_v45  ;;  %v3640_v18 = vadd.f32 %v3638_v15, %v5540_v26 }
0x1e72   :  { %v3643_v41 = vsel %vm188_vm0, %v3641_v39, 0.0  ;;  %v3642_v14 = vmul.f32 %v3640_v18, %v3640_v18 }
0x1e73   :  { %3644 = vadd.xlane.f32.xlu0 %v3643_v41 }
0x1e74   :  { %v3646_v8 = vsel %vm188_vm0, %v3642_v14, 0.0 }
0x1e75   :  { %3647 = vadd.xlane.f32.xlu1 %v3646_v8 }
0x1f00   :  { %v3645_v0 = vpop.xlane.xlu0 %3644 }
0x1f01   :  { %v3649_v20 = vmax.f32 %v3645_v0, 1e-12 }
0x1f02   :  { %v3648_v11 = vpop.xlane.xlu1 %3647 }
0x1f03   :  { %4631 = vrsqrt.f32 %v3649_v20  ;;  %v3650_v47 = vmax.f32 %v3648_v11, 1e-12 }
0x1f05   :  { %4633 = vrsqrt.f32 %v3650_v47 }
0x1f0d   :  { %v4632_v26 = vpop.eup %4631 }
0x1f0e   :  { %v3653_v54 = vmul.f32 %v4632_v26, %v3639_v45 }
0x1f0f   :  { %v4634_v27 = vpop.eup %4633 }
0x1f10   :  { %v3654_v29 = vmul.f32 %v4634_v27, %v3640_v18 }
0x1f12   :  { %v3655_v55 = vpack.c.bf16 %v3654_v29, %v3653_v54 }
0x1f14   :  { %4335 = vmatmul.mubr.msk.bf16.vlgmr.msra.gmra.mrb[92].mxu1 %vm188_vm0, %v3655_v55 }
0x1fe7   :  { %v3709_v22 = vpop.f32.mrb[92].mxu1 }
0x1fe8   :  { %3716 = vst [vmem:[#allocation11] sm:$0xff] %v3709_v22  ;;  %v4336_v19 = vpop.f32.mrb[93].mxu1 }
0x1fe9   :  { %v3712_v17 = vpop.f32.mrb[94].mxu1 }
0x1fea   :  { %3717 = vst [vmem:[#allocation11 + $0x8] sm:$0xff] %v3712_v17  ;;  %v4337_v1 = vpop.f32.mrb[95].mxu1 }
0x1feb   :  { %4760 = shalt.err (!%p4757_p2)
}
0x1fec   :  { %s4761_s11 = scalar_lea.hbm %s5606_s9, 256 }
0x1fed   :  { %p4762_p3 = scmp.ne.s32.totalorder %s5606_s9, %s4761_s11  ;;  %p4765_p4 = scmp.lt.u32.totalorder %s4761_s11, %s5606_s9 }
0x1fef   :  { %p4767_p5 = pnand %p4765_p4, %p4762_p3 }
0x1ff1   :  { %4770 = shalt.err (!%p4767_p5)
}
0x1ff2   :  { %3729 = dma.vmem_to_hbm [thread:$0]  %s3724_s17, 256, %s5606_s9, [#allocation4], %s4781_s21, %s4781_s21, %s4782_s22  }
0x1ff3   :  { %4777 = dma.done.wait [#allocation4], 256  }
0x1ff4   :  { %4778 = vsyncadd [#allocation4], 4294967040 }
0x1ff5   :  { %3733 = vsyncpa [#allocation3], 1 }
0x1ff6   :  { %3734 = vsyncpa [#allocation6], 1 }
0x1ff7   :  { %3735 = vsyncpa [#allocation9], 1 }
0x1ff8   :  { %3736 = vsyncpa [#allocation4], 1 }

</bundles_post_ra>
